<compile_context>
chip_gen: v5e
topology: v5e:2x2
jax: 0.10.0
libtpu: 0.0.40
codegen_flags: <defaults>
</compile_context>

<pallas_src>
import functools

import numpy as np
import jax
import jax.numpy as jnp
from jax import lax
from jax.experimental import pallas as pl
from jax.experimental.pallas import tpu as pltpu

_BN_EPS = 1e-5
_VMEM_LIMIT = 48 * 1024 * 1024   # > default scoped 32 MiB, <= v7x physical 64 MiB


def _round_up(x, m):
    return (x + m - 1) // m * m


def _pick_tile(mp, target):
    """Lane tile for the flattened pixel axis: a multiple of 128, <= target."""
    return min(_round_up(target, 128), _round_up(mp, 128))


# -----------------------------------------------------------------------------
# Kernels
# -----------------------------------------------------------------------------
def _linear_kernel(z_ref, w_ref, b_ref, o_ref):
    acc = jnp.dot(z_ref[...], w_ref[...], preferred_element_type=jnp.float32)
    o_ref[...] = (acc + b_ref[...]).astype(o_ref.dtype)


def _silu(y):
    # Exact SiLU with a single EUP op: y*sigmoid(y) == 0.5*y*(1 + tanh(0.5*y)).
    return 0.5 * y * (1.0 + jnp.tanh(0.5 * y))


def _convt_bn_silu_kernel(x_ref, mask_ref, w_ref, g_ref, b_ref, o_ref,
                          sum_ref, sq_ref, scale_ref, shift_ref, *,
                          tile_m, win, row, c_out, inv_n):
    """Fused ConvTranspose2d(3,2,1,1) + BatchNorm2d(train) + SiLU, M-tiled.

    grid = (2, n_tiles): pass 0 accumulates BN batch statistics into scratch,
    pass 1 normalises + activates and writes the output tiles.

    x_ref    : (C_in, L_in) bf16 -- whole activation, zero hi-padded and
               flattened over (B, H+1, W+1); constant index map (fetched once).
    mask_ref : (1, tile_m)  f32  -- 1.0 where the column is a real input pixel.
    w_ref    : (4*C_out, 4*C_in) bf16 block-structured phase/tap weight.
    o_ref    : (4*C_out, tile_m) bf16, rows = the 4 output phases stacked.
    """
    p = pl.program_id(0)
    t = pl.program_id(1)
    n_t = pl.num_programs(1)
    base = pl.multiple_of(t * tile_m, tile_m)

    # One aligned window load, then static lane shifts give the 4 shifted slabs.
    window = x_ref[:, pl.ds(base, win)]                     # (C_in, tile_m + halo)
    rhs = jnp.concatenate(
        [window[:, 0:tile_m],                               # x[i,   j  ]
         window[:, 1:1 + tile_m],                           # x[i,   j+1]
         window[:, row:row + tile_m],                       # x[i+1, j  ]
         window[:, row + 1:row + 1 + tile_m]],              # x[i+1, j+1]
        axis=0)                                             # (4*C_in, tile_m)
    # ConvT bias intentionally omitted: training-mode BN cancels it exactly.
    y = jnp.dot(w_ref[...], rhs, preferred_element_type=jnp.float32)  # (4*C_out, tile_m)

    @pl.when(p == 0)
    def _stats_pass():
        @pl.when(t == 0)
        def _init():
            sum_ref[...] = jnp.zeros_like(sum_ref)
            sq_ref[...] = jnp.zeros_like(sq_ref)

        ym = y * mask_ref[...]                              # drop pad/tail columns
        sum_ref[...] += ym.sum(axis=1, keepdims=True)
        sq_ref[...] += (ym * ym).sum(axis=1, keepdims=True)

        @pl.when(t == n_t - 1)
        def _finalize():
            s = sum_ref[...]
            q = sq_ref[...]
            s_c = (s[0:c_out] + s[c_out:2 * c_out] +
                   s[2 * c_out:3 * c_out] + s[3 * c_out:4 * c_out])
            q_c = (q[0:c_out] + q[c_out:2 * c_out] +
                   q[2 * c_out:3 * c_out] + q[3 * c_out:4 * c_out])
            mean = s_c * inv_n
            var = q_c * inv_n - mean * mean                 # biased (training-mode BN)
            sc = g_ref[...] * lax.rsqrt(var + _BN_EPS)
            sh = b_ref[...] - mean * sc
            scale_ref[...] = jnp.concatenate([sc, sc, sc, sc], axis=0)
            shift_ref[...] = jnp.concatenate([sh, sh, sh, sh], axis=0)

    # Pass 0 never writes o_ref; its writebacks are dead and fully overwritten
    # by pass 1, which rewrites every output tile.
    @pl.when(p == 1)
    def _apply_pass():
        yn = y * scale_ref[...] + shift_ref[...]
        o_ref[...] = _silu(yn).astype(o_ref.dtype)


def _conv3x3_tanh_kernel(x_ref, w_ref, b_ref, o_ref, *, tile_m, win, row):
    """Fused 3x3 stride-1 same-pad Conv2d + bias + tanh, M-tiled.

    x_ref: (C_in, L_in) bf16, zero-padded (lo+hi) activation flattened over
    (B, H+2, W+2); w_ref: (C_out, 9*C_in) with tap order k = kh*3+kw.
    """
    t = pl.program_id(0)
    base = pl.multiple_of(t * tile_m, tile_m)
    window = x_ref[:, pl.ds(base, win)]                     # (C_in, tile_m + halo)
    slabs = [window[:, kh * row + kw: kh * row + kw + tile_m]
             for kh in range(3) for kw in range(3)]
    rhs = jnp.concatenate(slabs, axis=0)                    # (9*C_in, tile_m)
    acc = jnp.dot(w_ref[...], rhs, preferred_element_type=jnp.float32)
    o_ref[...] = jnp.tanh(acc + b_ref[...]).astype(o_ref.dtype)


# -----------------------------------------------------------------------------
# pallas_call wrappers
# -----------------------------------------------------------------------------
def linear_gemm(z, w, b):
    B, K = z.shape
    N = w.shape[1]
    return pl.pallas_call(
        _linear_kernel,
        out_shape=jax.ShapeDtypeStruct((B, N), jnp.bfloat16),
        grid=(1,),
        in_specs=[pl.BlockSpec((B, K), lambda i: (0, 0)),
                  pl.BlockSpec((K, N), lambda i: (0, 0)),
                  pl.BlockSpec((1, N), lambda i: (0, 0))],
        out_specs=pl.BlockSpec((B, N), lambda i: (0, 0)),
        compiler_params=pltpu.CompilerParams(
            dimension_semantics=("arbitrary",), vmem_limit_bytes=_VMEM_LIMIT),
    )(z, w, b)


def convt_bn_silu_block(x, blk, tile_target):
    """x: (C_in, B, H, W) bf16 -> (C_out, B, 2H, 2W) bf16."""
    c_in, B, H, W = x.shape
    c_out = blk["w_big"].shape[0] // 4
    hp, wp = H + 1, W + 1                       # hi-side zero padding
    mp = B * hp * wp                            # padded pixel enumeration length
    tm = _pick_tile(mp, tile_target)
    n_t = pl.cdiv(mp, tm)
    halo = _round_up(wp + 1, 128)               # largest static shift is wp + 1
    l_out = n_t * tm
    l_in = l_out + halo

    xp = jnp.pad(x, ((0, 0), (0, 0), (0, 1), (0, 1))).reshape(c_in, mp)
    xp = jnp.pad(xp, ((0, 0), (0, l_in - mp))).astype(jnp.bfloat16)
    mask = jnp.pad(jnp.ones((B, H, W), jnp.float32), ((0, 0), (0, 1), (0, 1)))
    mask = jnp.pad(mask.reshape(1, mp), ((0, 0), (0, l_out - mp)))

    kern = functools.partial(_convt_bn_silu_kernel, tile_m=tm, win=tm + halo,
                             row=wp, c_out=c_out, inv_n=1.0 / (4.0 * B * H * W))
    y = pl.pallas_call(
        kern,
        out_shape=jax.ShapeDtypeStruct((4 * c_out, l_out), jnp.bfloat16),
        grid=(2, n_t),                          # (stats pass / apply pass, pixel tiles)
        in_specs=[pl.BlockSpec((c_in, l_in), lambda p, t: (0, 0)),   # resident, 1 fetch
                  pl.BlockSpec((1, tm), lambda p, t: (0, t)),
                  pl.BlockSpec((4 * c_out, 4 * c_in), lambda p, t: (0, 0)),
                  pl.BlockSpec((c_out, 1), lambda p, t: (0, 0)),
                  pl.BlockSpec((c_out, 1), lambda p, t: (0, 0))],
        out_specs=pl.BlockSpec((4 * c_out, tm), lambda p, t: (0, t)),
        scratch_shapes=[pltpu.VMEM((4 * c_out, 1), jnp.float32)] * 4,
        compiler_params=pltpu.CompilerParams(
            # TODO(synk): the pixel axis could be "parallel" on v7x megacore if the
            # BN statistics were reduced across cores; with a single VMEM scratch
            # carrying the sums it must stay sequential.
            dimension_semantics=("arbitrary", "arbitrary"),
            vmem_limit_bytes=_VMEM_LIMIT),
    )(xp, mask, blk["w_big"], blk["gamma"], blk["beta"])

    # Drop pad columns and interleave the 4 phase planes -> (C_out, B, 2H, 2W).
    # TODO(synk): this interleave is still an XLA HBM round trip; chaining blocks
    # in phase-plane layout (interleaving once at the end) would remove it.
    ys = y[:, :mp].reshape(4, c_out, B, hp, wp)[:, :, :, :H, :W]
    z = ys.reshape(2, 2, c_out, B, H, W).transpose(2, 3, 4, 0, 5, 1)
    return z.reshape(c_out, B, 2 * H, 2 * W)


def conv3x3_tanh_block(x, w9, bias, tile_target):
    """x: (C_in, B, H, W) -> (B, C_out, H, W) f32 (3x3 same-pad conv + tanh)."""
    c_in, B, H, W = x.shape
    c_out = w9.shape[0]
    hp, wp = H + 2, W + 2
    mp = B * hp * wp
    tm = _pick_tile(mp, tile_target)
    n_t = pl.cdiv(mp, tm)
    halo = _round_up(2 * wp + 3, 128)           # largest static shift is 2*wp + 2
    l_out = n_t * tm
    l_in = l_out + halo

    xp = jnp.pad(x, ((0, 0), (0, 0), (1, 1), (1, 1))).reshape(c_in, mp)
    xp = jnp.pad(xp, ((0, 0), (0, l_in - mp))).astype(jnp.bfloat16)

    kern = functools.partial(_conv3x3_tanh_kernel, tile_m=tm, win=tm + halo, row=wp)
    y = pl.pallas_call(
        kern,
        out_shape=jax.ShapeDtypeStruct((c_out, l_out), jnp.float32),
        grid=(n_t,),
        in_specs=[pl.BlockSpec((c_in, l_in), lambda t: (0, 0)),          # resident
                  pl.BlockSpec((c_out, 9 * c_in), lambda t: (0, 0)),
                  pl.BlockSpec((c_out, 1), lambda t: (0, 0))],
        out_specs=pl.BlockSpec((c_out, tm), lambda t: (0, t)),
        compiler_params=pltpu.CompilerParams(
            dimension_semantics=("parallel",), vmem_limit_bytes=_VMEM_LIMIT),
    )(xp, w9, bias)
    out = y[:, :mp].reshape(c_out, B, hp, wp)[:, :, :H, :W]
    return out.transpose(1, 0, 2, 3)


# -----------------------------------------------------------------------------
# Parameters (PyTorch layout) and one-time GEMM-layout preparation
# -----------------------------------------------------------------------------
def init_params(key, latent_dim, in_channels, hidden_dims, reduced_dims):
    keys = iter(jax.random.split(key, 64))

    def rn(shape, scale=0.1):
        return (scale * jax.random.normal(next(keys), shape)).astype(jnp.float32)

    params = {
        "lin_w": rn((latent_dim, hidden_dims[0] * reduced_dims ** 2)),
        "lin_b": rn((hidden_dims[0] * reduced_dims ** 2,)),
        "blocks": [],
        "final_ct_w": rn((hidden_dims[-1], hidden_dims[-1], 3, 3)),   # ConvT (Cin,Cout,kh,kw)
        "final_ct_b": rn((hidden_dims[-1],)),
        "final_gamma": 1.0 + rn((hidden_dims[-1],)),
        "final_beta": rn((hidden_dims[-1],)),
        "final_conv_w": rn((in_channels, hidden_dims[-1], 3, 3)),     # Conv (Cout,Cin,kh,kw)
        "final_conv_b": rn((in_channels,)),
    }
    for i in range(len(hidden_dims) - 1):
        params["blocks"].append(dict(
            wt=rn((hidden_dims[i], hidden_dims[i + 1], 3, 3)),
            bt=rn((hidden_dims[i + 1],)),
            gamma=1.0 + rn((hidden_dims[i + 1],)),
            beta=rn((hidden_dims[i + 1],)),
        ))
    return params


def _phase_weight(w_ct):
    """ConvT weight (C_in, C_out, 3, 3) -> block-structured (4*C_out, 4*C_in).

    Row blocks = output phases (dy,dx) in order (0,0),(0,1),(1,0),(1,1); column
    blocks = shifted input slabs x[i,j], x[i,j+1], x[i+1,j], x[i+1,j+1].
    Derived from oy = 2*iy - 1 + kh, ox = 2*ix - 1 + kw (stride 2, pad 1, op 1).
    """
    c_in, c_out = w_ct.shape[0], w_ct.shape[1]
    taps = jnp.transpose(w_ct, (2, 3, 1, 0)).reshape(9, c_out, c_in)   # k=kh*3+kw
    wb = jnp.zeros((4 * c_out, 4 * c_in), jnp.float32)

    def put(wb, phase, slab, k):
        return wb.at[phase * c_out:(phase + 1) * c_out,
                     slab * c_in:(slab + 1) * c_in].set(taps[k])

    wb = put(wb, 0, 0, 4)
    wb = put(wb, 1, 1, 3); wb = put(wb, 1, 0, 5)
    wb = put(wb, 2, 2, 1); wb = put(wb, 2, 0, 7)
    wb = put(wb, 3, 3, 0); wb = put(wb, 3, 2, 2); wb = put(wb, 3, 1, 6); wb = put(wb, 3, 0, 8)
    return wb.astype(jnp.bfloat16)


def prepare_gemm_params(params):
    """Precompute all kernel-ready (GEMM layout, bf16) weights exactly once."""
    col = lambda v: v.reshape(-1, 1).astype(jnp.float32)

    def conv_taps(w):    # Conv weight (C_out, C_in, 3, 3) -> (C_out, 9*C_in), k=kh*3+kw
        co, ci = w.shape[0], w.shape[1]
        return jnp.transpose(w, (0, 2, 3, 1)).reshape(co, 9 * ci).astype(jnp.bfloat16)

    # NOTE: ConvTranspose biases are not passed to the kernels -- a per-channel
    # bias is exactly cancelled by training-mode BatchNorm (mean absorbs it).
    blocks = [dict(w_big=_phase_weight(b["wt"]), gamma=col(b["gamma"]), beta=col(b["beta"]))
              for b in params["blocks"]]
    blocks.append(dict(w_big=_phase_weight(params["final_ct_w"]),
                       gamma=col(params["final_gamma"]), beta=col(params["final_beta"])))
    return {
        "lin_w": params["lin_w"].astype(jnp.bfloat16),
        "lin_b": params["lin_b"].reshape(1, -1).astype(jnp.float32),
        "blocks": blocks,
        "final_conv_w9": conv_taps(params["final_conv_w"]),
        "final_conv_b": col(params["final_conv_b"]),
    }


# -----------------------------------------------------------------------------
# Forward pass (mirrors CNNVariationalDecoder.forward)
# -----------------------------------------------------------------------------
def cnn_variational_decoder_fwd(z, prep, *, hidden0, reduced_dims, tile_target=512):
    B = z.shape[0]
    h = linear_gemm(z.astype(jnp.bfloat16), prep["lin_w"], prep["lin_b"])   # (B, C0*rd*rd)
    # view(-1, C0, rd, rd), then channels-first (C, B, H, W) for GEMM layout.
    # TODO(synk): the tiny first stage (B*rd*rd < 128 lanes) could be fused with
    # the first ConvT block to avoid one launch plus this transpose.
    x = h.reshape(B, hidden0, reduced_dims, reduced_dims).transpose(1, 0, 2, 3)
    for blk in prep["blocks"]:
        x = convt_bn_silu_block(x, blk, tile_target)
    return conv3x3_tanh_block(x, prep["final_conv_w9"], prep["final_conv_b"], tile_target)


# -----------------------------------------------------------------------------
# Pure-numpy float64 reference of the PyTorch module (training mode)
# -----------------------------------------------------------------------------
def _ref_forward(z, params, hidden0, rd):
    f = lambda a: np.asarray(a, np.float64)
    silu = lambda v: v / (1.0 + np.exp(-v))

    def convt(x, w):                            # ConvT k3 s2 p1 op1; w (Cin,Cout,3,3)
        B, ci, H, W = x.shape
        co = w.shape[1]
        out = np.zeros((B, co, 2 * H, 2 * W))
        for kh in range(3):
            for kw in range(3):
                contrib = np.einsum('bchw,cd->bdhw', x, w[:, :, kh, kw])
                oy = 2 * np.arange(H) - 1 + kh
                ox = 2 * np.arange(W) - 1 + kw
                my, mx = (oy >= 0) & (oy < 2 * H), (ox >= 0) & (ox < 2 * W)
                out[np.ix_(np.arange(B), np.arange(co), oy[my], ox[mx])] += \
                    contrib[np.ix_(np.arange(B), np.arange(co),
                                   np.where(my)[0], np.where(mx)[0])]
        return out

    def conv3(x, w):                            # Conv k3 s1 p1; w (Cout,Cin,3,3)
        B, ci, H, W = x.shape
        xp = np.pad(x, ((0, 0), (0, 0), (1, 1), (1, 1)))
        out = np.zeros((B, w.shape[0], H, W))
        for kh in range(3):
            for kw in range(3):
                out += np.einsum('bchw,dc->bdhw',
                                 xp[:, :, kh:kh + H, kw:kw + W], w[:, :, kh, kw])
        return out

    def bn(x, gamma, beta):
        mean = x.mean(axis=(0, 2, 3), keepdims=True)
        var = x.var(axis=(0, 2, 3), keepdims=True)          # biased, training mode
        return (gamma[None, :, None, None] * (x - mean) / np.sqrt(var + _BN_EPS)
                + beta[None, :, None, None])

    x = f(z) @ f(params["lin_w"]) + f(params["lin_b"])
    x = x.reshape(z.shape[0], hidden0, rd, rd)
    blocks = list(params["blocks"]) + [dict(wt=params["final_ct_w"],
                                            bt=params["final_ct_b"],
                                            gamma=params["final_gamma"],
                                            beta=params["final_beta"])]
    for blk in blocks:
        x = convt(x, f(blk["wt"])) + f(blk["bt"])[None, :, None, None]
        x = silu(bn(x, f(blk["gamma"]), f(blk["beta"])))
    x = conv3(x, f(params["final_conv_w"])) + f(params["final_conv_b"])[None, :, None, None]
    return np.tanh(x)


# -----------------------------------------------------------------------------
if __name__ == "__main__":
    # Small config: latent_dim=8, in_channels=4, image_dim=16, hidden_dims=[32,16]
    #   reduced_dims = 16 // 2**2 = 4  ->  output (B, 4, 16, 16)
    latent_dim = 8
    in_channels = 4
    image_dim = 16
    hidden_dims = [32, 16]
    reduced_dims = image_dim // (2 ** len(hidden_dims))
    batch = 2

    key = jax.random.PRNGKey(0)
    kz, kp = jax.random.split(key)
    z = jax.random.normal(kz, (batch, latent_dim), dtype=jnp.float32)
    params = init_params(kp, latent_dim, in_channels, hidden_dims, reduced_dims)
    prep = prepare_gemm_params(params)

    fwd = jax.jit(functools.partial(cnn_variational_decoder_fwd,
                                    hidden0=hidden_dims[0],
                                    reduced_dims=reduced_dims,
                                    tile_target=512))
    out = jax.block_until_ready(fwd(z, prep))
    assert out.shape == (batch, in_channels, image_dim, image_dim), out.shape
    assert bool(jnp.all(jnp.isfinite(out)))

    # Numerical check against the numpy reference (bf16 MXU -> loose tolerance).
    ref = _ref_forward(np.asarray(z), params, hidden_dims[0], reduced_dims)
    err = float(np.max(np.abs(np.asarray(out, np.float64) - ref)))
    assert err < 0.15, f"max abs error vs reference too large: {err}"

    # Small-tile variant exercises the multi-tile BN-stats accumulation path.
    fwd_small = jax.jit(functools.partial(cnn_variational_decoder_fwd,
                                          hidden0=hidden_dims[0],
                                          reduced_dims=reduced_dims,
                                          tile_target=128))
    out_small = jax.block_until_ready(fwd_small(z, prep))
    err_tile = float(np.max(np.abs(np.asarray(out, np.float64) -
                                   np.asarray(out_small, np.float64))))
    assert err_tile < 0.05, f"tiling-dependent mismatch: {err_tile}"

    print("KERNEL_OK")
</pallas_src>

<mosaic_0001>
module attributes {stable_mosaic.version = 11 : i64} {
  func.func @_linear_kernel(%arg0: i32, %arg1: memref<2x8xbf16, #tpu.memory_space<vmem>>, %arg2: memref<8x512xbf16, #tpu.memory_space<vmem>>, %arg3: memref<1x512xf32, #tpu.memory_space<vmem>>, %arg4: memref<2x512xbf16, #tpu.memory_space<vmem>>) attributes {dimension_semantics = [#tpu.dimension_semantics<arbitrary>], iteration_bounds = array<i64: 1>, scalar_prefetch = 0 : i64, scratch_operands = 0 : i64, tpu.core_type = #tpu.core_type<tc>, window_params = [{pipeline_mode = #tpu.pipeline_mode<synchronous>, transform_indices = @transform_0, window_bounds = array<i64: 2, 8>}, {pipeline_mode = #tpu.pipeline_mode<synchronous>, transform_indices = @transform_1, window_bounds = array<i64: 8, 512>}, {pipeline_mode = #tpu.pipeline_mode<synchronous>, transform_indices = @transform_2, window_bounds = array<i64: 1, 512>}, {pipeline_mode = #tpu.pipeline_mode<synchronous>, transform_indices = @transform_3, window_bounds = array<i64: 2, 512>}]} {
    %c0 = arith.constant 0 : index
    %c0_0 = arith.constant 0 : index
    %0 = vector.load %arg1[%c0, %c0_0] : memref<2x8xbf16, #tpu.memory_space<vmem>>, vector<2x8xbf16>
    %c0_1 = arith.constant 0 : index
    %c0_2 = arith.constant 0 : index
    %1 = vector.load %arg2[%c0_1, %c0_2] : memref<8x512xbf16, #tpu.memory_space<vmem>>, vector<8x512xbf16>
    %cst = arith.constant dense<0.000000e+00> : vector<2x512xf32>
    %2 = tpu.matmul %0, %1, %cst {dimension_numbers = #tpu.dot_dimension_numbers<[1], [0], [0], [1], [0, 0, 1, 1], [], []>} : vector<2x8xbf16>, vector<8x512xbf16>, vector<2x512xf32> -> vector<2x512xf32>
    %c0_3 = arith.constant 0 : index
    %c0_4 = arith.constant 0 : index
    %3 = vector.load %arg3[%c0_3, %c0_4] : memref<1x512xf32, #tpu.memory_space<vmem>>, vector<1x512xf32>
    %4 = vector.broadcast %3 : vector<1x512xf32> to vector<2x512xf32>
    %5 = arith.addf %2, %4 : vector<2x512xf32>
    %6 = arith.truncf %5 : vector<2x512xf32> to vector<2x512xbf16>
    %c0_5 = arith.constant 0 : index
    %c0_6 = arith.constant 0 : index
    %7 = vector.load %arg4[%c0_5, %c0_6] : memref<2x512xbf16, #tpu.memory_space<vmem>>, vector<2x512xbf16>
    tpu.vector_store %arg4[%c0_5, %c0_6], %6 {strides = array<i32>} : memref<2x512xbf16, #tpu.memory_space<vmem>>, vector<2x512xbf16>,
    return
  }
  func.func @transform_0(%arg0: i32) -> (i32, i32) {
    %c0_i32 = arith.constant 0 : i32
    %c0_i32_0 = arith.constant 0 : i32
    %c0_i32_1 = arith.constant 0 : i32
    return %c0_i32, %c0_i32_0 : i32, i32
  }
  func.func @transform_1(%arg0: i32) -> (i32, i32) {
    %c0_i32 = arith.constant 0 : i32
    %c0_i32_0 = arith.constant 0 : i32
    %c0_i32_1 = arith.constant 0 : i32
    return %c0_i32, %c0_i32_0 : i32, i32
  }
  func.func @transform_2(%arg0: i32) -> (i32, i32) {
    %c0_i32 = arith.constant 0 : i32
    %c0_i32_0 = arith.constant 0 : i32
    %c0_i32_1 = arith.constant 0 : i32
    return %c0_i32, %c0_i32_0 : i32, i32
  }
  func.func @transform_3(%arg0: i32) -> (i32, i32) {
    %c0_i32 = arith.constant 0 : i32
    %c0_i32_0 = arith.constant 0 : i32
    %c0_i32_1 = arith.constant 0 : i32
    return %c0_i32, %c0_i32_0 : i32, i32
  }
}

module attributes {stable_mosaic.version = 11 : i64} {
  func.func @_convt_bn_silu_kernel(%arg0: i32, %arg1: i32, %arg2: memref<32x256xbf16, #tpu.memory_space<vmem>>, %arg3: memref<1x128xf32, #tpu.memory_space<vmem>>, %arg4: memref<64x128xbf16, #tpu.memory_space<vmem>>, %arg5: memref<16x1xf32, #tpu.memory_space<vmem>>, %arg6: memref<16x1xf32, #tpu.memory_space<vmem>>, %arg7: memref<64x128xbf16, #tpu.memory_space<vmem>>, %arg8: memref<64x1xf32, #tpu.memory_space<vmem>>, %arg9: memref<64x1xf32, #tpu.memory_space<vmem>>, %arg10: memref<64x1xf32, #tpu.memory_space<vmem>>, %arg11: memref<64x1xf32, #tpu.memory_space<vmem>>) attributes {dimension_semantics = [#tpu.dimension_semantics<arbitrary>, #tpu.dimension_semantics<arbitrary>], iteration_bounds = array<i64: 2, 1>, scalar_prefetch = 0 : i64, scratch_operands = 4 : i64, tpu.core_type = #tpu.core_type<tc>, window_params = [{pipeline_mode = #tpu.pipeline_mode<synchronous>, transform_indices = @transform_0, window_bounds = array<i64: 32, 256>}, {transform_indices = @transform_1, window_bounds = array<i64: 1, 128>}, {pipeline_mode = #tpu.pipeline_mode<synchronous>, transform_indices = @transform_2, window_bounds = array<i64: 64, 128>}, {pipeline_mode = #tpu.pipeline_mode<synchronous>, transform_indices = @transform_3, window_bounds = array<i64: 16, 1>}, {pipeline_mode = #tpu.pipeline_mode<synchronous>, transform_indices = @transform_4, window_bounds = array<i64: 16, 1>}, {transform_indices = @transform_5, window_bounds = array<i64: 64, 128>}]} {
    %c128_i32 = arith.constant 128 : i32
    %0 = arith.muli %arg1, %c128_i32 : i32
    %1 = tpu.assume_multiple %0, 128 : i32
    %c0 = arith.constant 0 : index
    %2 = arith.index_cast %1 : i32 to index
    %3 = vector.load %arg2[%c0, %2] : memref<32x256xbf16, #tpu.memory_space<vmem>>, vector<32x256xbf16>
    %4 = vector.extract_strided_slice %3 {offsets = [0, 0], sizes = [32, 128], strides = [1, 1]} : vector<32x256xbf16> to vector<32x128xbf16>
    %5 = vector.extract_strided_slice %3 {offsets = [0, 1], sizes = [32, 128], strides = [1, 1]} : vector<32x256xbf16> to vector<32x128xbf16>
    %6 = vector.extract_strided_slice %3 {offsets = [0, 5], sizes = [32, 128], strides = [1, 1]} : vector<32x256xbf16> to vector<32x128xbf16>
    %7 = vector.extract_strided_slice %3 {offsets = [0, 6], sizes = [32, 128], strides = [1, 1]} : vector<32x256xbf16> to vector<32x128xbf16>
    %8 = tpu.concatenate %4, %5, %6, %7 in 0 : vector<32x128xbf16>, vector<32x128xbf16>, vector<32x128xbf16>, vector<32x128xbf16> -> vector<128x128xbf16>
    %c0_0 = arith.constant 0 : index
    %c0_1 = arith.constant 0 : index
    %9 = vector.load %arg4[%c0_0, %c0_1] : memref<64x128xbf16, #tpu.memory_space<vmem>>, vector<64x128xbf16>
    %cst = arith.constant dense<0.000000e+00> : vector<64x128xf32>
    %10 = tpu.matmul %9, %8, %cst {dimension_numbers = #tpu.dot_dimension_numbers<[1], [0], [0], [1], [0, 0, 1, 1], [], []>} : vector<64x128xbf16>, vector<128x128xbf16>, vector<64x128xf32> -> vector<64x128xf32>
    %c0_i32 = arith.constant 0 : i32
    %11 = arith.cmpi eq, %arg0, %c0_i32 : i32
    %12 = arith.extui %11 : i1 to i32
    %c0_i32_2 = arith.constant 0 : i32
    %13 = arith.cmpi ne, %12, %c0_i32_2 : i32
    scf.if %13 {
      %c0_i32_4 = arith.constant 0 : i32
      %17 = arith.cmpi eq, %arg1, %c0_i32_4 : i32
      %18 = arith.extui %17 : i1 to i32
      %c0_i32_5 = arith.constant 0 : i32
      %19 = arith.cmpi ne, %18, %c0_i32_5 : i32
      scf.if %19 {
        %cst_20 = arith.constant 0.000000e+00 : f32
        %37 = vector.broadcast %cst_20 : f32 to vector<64x1xf32>
        %c0_21 = arith.constant 0 : index
        %c0_22 = arith.constant 0 : index
        %38 = vector.load %arg8[%c0_21, %c0_22] : memref<64x1xf32, #tpu.memory_space<vmem>>, vector<64x1xf32>
        tpu.vector_store %arg8[%c0_21, %c0_22], %37 {strides = array<i32>} : memref<64x1xf32, #tpu.memory_space<vmem>>, vector<64x1xf32>,
        %cst_23 = arith.constant 0.000000e+00 : f32
        %39 = vector.broadcast %cst_23 : f32 to vector<64x1xf32>
        %c0_24 = arith.constant 0 : index
        %c0_25 = arith.constant 0 : index
        %40 = vector.load %arg9[%c0_24, %c0_25] : memref<64x1xf32, #tpu.memory_space<vmem>>, vector<64x1xf32>
        tpu.vector_store %arg9[%c0_24, %c0_25], %39 {strides = array<i32>} : memref<64x1xf32, #tpu.memory_space<vmem>>, vector<64x1xf32>,
      } else {
      }
      %c0_6 = arith.constant 0 : index
      %c0_7 = arith.constant 0 : index
      %20 = vector.load %arg3[%c0_6, %c0_7] : memref<1x128xf32, #tpu.memory_space<vmem>>, vector<1x128xf32>
      %21 = vector.broadcast %20 : vector<1x128xf32> to vector<64x128xf32>
      %22 = arith.mulf %10, %21 : vector<64x128xf32>
      %c0_8 = arith.constant 0 : index
      %c0_9 = arith.constant 0 : index
      %23 = vector.load %arg8[%c0_8, %c0_9] : memref<64x1xf32, #tpu.memory_space<vmem>>, vector<64x1xf32>
      %cst_10 = arith.constant dense<0.000000e+00> : vector<64xf32>
      %24 = vector.multi_reduction <add>, %22, %cst_10 [1] : vector<64x128xf32> to vector<64xf32>
      %25 = vector.shape_cast %24 : vector<64xf32> to vector<64x1xf32>
      %26 = arith.addf %23, %25 : vector<64x1xf32>
      %c0_11 = arith.constant 0 : index
      %c0_12 = arith.constant 0 : index
      %27 = vector.load %arg8[%c0_11, %c0_12] : memref<64x1xf32, #tpu.memory_space<vmem>>, vector<64x1xf32>
      tpu.vector_store %arg8[%c0_11, %c0_12], %26 {strides = array<i32>} : memref<64x1xf32, #tpu.memory_space<vmem>>, vector<64x1xf32>,
      %c0_13 = arith.constant 0 : index
      %c0_14 = arith.constant 0 : index
      %28 = vector.load %arg9[%c0_13, %c0_14] : memref<64x1xf32, #tpu.memory_space<vmem>>, vector<64x1xf32>
      %29 = arith.mulf %22, %22 : vector<64x128xf32>
      %cst_15 = arith.constant dense<0.000000e+00> : vector<64xf32>
      %30 = vector.multi_reduction <add>, %29, %cst_15 [1] : vector<64x128xf32> to vector<64xf32>
      %31 = vector.shape_cast %30 : vector<64xf32> to vector<64x1xf32>
      %32 = arith.addf %28, %31 : vector<64x1xf32>
      %c0_16 = arith.constant 0 : index
      %c0_17 = arith.constant 0 : index
      %33 = vector.load %arg9[%c0_16, %c0_17] : memref<64x1xf32, #tpu.memory_space<vmem>>, vector<64x1xf32>
      tpu.vector_store %arg9[%c0_16, %c0_17], %32 {strides = array<i32>} : memref<64x1xf32, #tpu.memory_space<vmem>>, vector<64x1xf32>,
      %c0_i32_18 = arith.constant 0 : i32
      %34 = arith.cmpi eq, %arg1, %c0_i32_18 : i32
      %35 = arith.extui %34 : i1 to i32
      %c0_i32_19 = arith.constant 0 : i32
      %36 = arith.cmpi ne, %35, %c0_i32_19 : i32
      scf.if %36 {
        %c0_20 = arith.constant 0 : index
        %c0_21 = arith.constant 0 : index
        %37 = vector.load %arg8[%c0_20, %c0_21] : memref<64x1xf32, #tpu.memory_space<vmem>>, vector<64x1xf32>
        %c0_22 = arith.constant 0 : index
        %c0_23 = arith.constant 0 : index
        %38 = vector.load %arg9[%c0_22, %c0_23] : memref<64x1xf32, #tpu.memory_space<vmem>>, vector<64x1xf32>
        %39 = vector.extract_strided_slice %37 {offsets = [0, 0], sizes = [16, 1], strides = [1, 1]} : vector<64x1xf32> to vector<16x1xf32>
        %40 = vector.extract_strided_slice %37 {offsets = [16, 0], sizes = [16, 1], strides = [1, 1]} : vector<64x1xf32> to vector<16x1xf32>
        %41 = arith.addf %39, %40 : vector<16x1xf32>
        %42 = vector.extract_strided_slice %37 {offsets = [32, 0], sizes = [16, 1], strides = [1, 1]} : vector<64x1xf32> to vector<16x1xf32>
        %43 = arith.addf %41, %42 : vector<16x1xf32>
        %44 = vector.extract_strided_slice %37 {offsets = [48, 0], sizes = [16, 1], strides = [1, 1]} : vector<64x1xf32> to vector<16x1xf32>
        %45 = arith.addf %43, %44 : vector<16x1xf32>
        %46 = vector.extract_strided_slice %38 {offsets = [0, 0], sizes = [16, 1], strides = [1, 1]} : vector<64x1xf32> to vector<16x1xf32>
        %47 = vector.extract_strided_slice %38 {offsets = [16, 0], sizes = [16, 1], strides = [1, 1]} : vector<64x1xf32> to vector<16x1xf32>
        %48 = arith.addf %46, %47 : vector<16x1xf32>
        %49 = vector.extract_strided_slice %38 {offsets = [32, 0], sizes = [16, 1], strides = [1, 1]} : vector<64x1xf32> to vector<16x1xf32>
        %50 = arith.addf %48, %49 : vector<16x1xf32>
        %51 = vector.extract_strided_slice %38 {offsets = [48, 0], sizes = [16, 1], strides = [1, 1]} : vector<64x1xf32> to vector<16x1xf32>
        %52 = arith.addf %50, %51 : vector<16x1xf32>
        %cst_24 = arith.constant 7.812500e-03 : f32
        %53 = vector.broadcast %cst_24 : f32 to vector<16x1xf32>
        %54 = arith.mulf %45, %53 : vector<16x1xf32>
        %cst_25 = arith.constant 7.812500e-03 : f32
        %55 = vector.broadcast %cst_25 : f32 to vector<16x1xf32>
        %56 = arith.mulf %52, %55 : vector<16x1xf32>
        %57 = arith.mulf %54, %54 : vector<16x1xf32>
        %58 = arith.subf %56, %57 : vector<16x1xf32>
        %c0_26 = arith.constant 0 : index
        %c0_27 = arith.constant 0 : index
        %59 = vector.load %arg5[%c0_26, %c0_27] : memref<16x1xf32, #tpu.memory_space<vmem>>, vector<16x1xf32>
        %cst_28 = arith.constant 9.99999974E-6 : f32
        %60 = vector.broadcast %cst_28 : f32 to vector<16x1xf32>
        %61 = arith.addf %58, %60 : vector<16x1xf32>
        %62 = math.rsqrt %61 : vector<16x1xf32>
        %63 = arith.mulf %59, %62 : vector<16x1xf32>
        %c0_29 = arith.constant 0 : index
        %c0_30 = arith.constant 0 : index
        %64 = vector.load %arg6[%c0_29, %c0_30] : memref<16x1xf32, #tpu.memory_space<vmem>>, vector<16x1xf32>
        %65 = arith.mulf %54, %63 : vector<16x1xf32>
        %66 = arith.subf %64, %65 : vector<16x1xf32>
        %67 = tpu.concatenate %63, %63, %63, %63 in 0 : vector<16x1xf32>, vector<16x1xf32>, vector<16x1xf32>, vector<16x1xf32> -> vector<64x1xf32>
        %c0_31 = arith.constant 0 : index
        %c0_32 = arith.constant 0 : index
        %68 = vector.load %arg10[%c0_31, %c0_32] : memref<64x1xf32, #tpu.memory_space<vmem>>, vector<64x1xf32>
        tpu.vector_store %arg10[%c0_31, %c0_32], %67 {strides = array<i32>} : memref<64x1xf32, #tpu.memory_space<vmem>>, vector<64x1xf32>,
        %69 = tpu.concatenate %66, %66, %66, %66 in 0 : vector<16x1xf32>, vector<16x1xf32>, vector<16x1xf32>, vector<16x1xf32> -> vector<64x1xf32>
        %c0_33 = arith.constant 0 : index
        %c0_34 = arith.constant 0 : index
        %70 = vector.load %arg11[%c0_33, %c0_34] : memref<64x1xf32, #tpu.memory_space<vmem>>, vector<64x1xf32>
        tpu.vector_store %arg11[%c0_33, %c0_34], %69 {strides = array<i32>} : memref<64x1xf32, #tpu.memory_space<vmem>>, vector<64x1xf32>,
      } else {
      }
    } else {
    }
    %c1_i32 = arith.constant 1 : i32
    %14 = arith.cmpi eq, %arg0, %c1_i32 : i32
    %15 = arith.extui %14 : i1 to i32
    %c0_i32_3 = arith.constant 0 : i32
    %16 = arith.cmpi ne, %15, %c0_i32_3 : i32
    scf.if %16 {
      %c0_4 = arith.constant 0 : index
      %c0_5 = arith.constant 0 : index
      %17 = vector.load %arg10[%c0_4, %c0_5] : memref<64x1xf32, #tpu.memory_space<vmem>>, vector<64x1xf32>
      %18 = vector.broadcast %17 : vector<64x1xf32> to vector<64x128xf32>
      %19 = arith.mulf %10, %18 : vector<64x128xf32>
      %c0_6 = arith.constant 0 : index
      %c0_7 = arith.constant 0 : index
      %20 = vector.load %arg11[%c0_6, %c0_7] : memref<64x1xf32, #tpu.memory_space<vmem>>, vector<64x1xf32>
      %21 = vector.broadcast %20 : vector<64x1xf32> to vector<64x128xf32>
      %22 = arith.addf %19, %21 : vector<64x128xf32>
      %cst_8 = arith.constant 5.000000e-01 : f32
      %23 = vector.broadcast %cst_8 : f32 to vector<64x128xf32>
      %24 = arith.mulf %23, %22 : vector<64x128xf32>
      %cst_9 = arith.constant 5.000000e-01 : f32
      %25 = vector.broadcast %cst_9 : f32 to vector<64x128xf32>
      %26 = arith.mulf %25, %22 : vector<64x128xf32>
      %27 = math.tanh %26 : vector<64x128xf32>
      %cst_10 = arith.constant 1.000000e+00 : f32
      %28 = vector.broadcast %cst_10 : f32 to vector<64x128xf32>
      %29 = arith.addf %28, %27 : vector<64x128xf32>
      %30 = arith.mulf %24, %29 : vector<64x128xf32>
      %31 = arith.truncf %30 : vector<64x128xf32> to vector<64x128xbf16>
      %c0_11 = arith.constant 0 : index
      %c0_12 = arith.constant 0 : index
      %32 = vector.load %arg7[%c0_11, %c0_12] : memref<64x128xbf16, #tpu.memory_space<vmem>>, vector<64x128xbf16>
      tpu.vector_store %arg7[%c0_11, %c0_12], %31 {strides = array<i32>} : memref<64x128xbf16, #tpu.memory_space<vmem>>, vector<64x128xbf16>,
    } else {
    }
    return
  }
  func.func @transform_0(%arg0: i32, %arg1: i32) -> (i32, i32) {
    %c0_i32 = arith.constant 0 : i32
    %c0_i32_0 = arith.constant 0 : i32
    %c0_i32_1 = arith.constant 0 : i32
    return %c0_i32, %c0_i32_0 : i32, i32
  }
  func.func @transform_1(%arg0: i32, %arg1: i32) -> (i32, i32) {
    %c0_i32 = arith.constant 0 : i32
    %c0_i32_0 = arith.constant 0 : i32
    return %c0_i32, %arg1 : i32, i32
  }
  func.func @transform_2(%arg0: i32, %arg1: i32) -> (i32, i32) {
    %c0_i32 = arith.constant 0 : i32
    %c0_i32_0 = arith.constant 0 : i32
    %c0_i32_1 = arith.constant 0 : i32
    return %c0_i32, %c0_i32_0 : i32, i32
  }
  func.func @transform_3(%arg0: i32, %arg1: i32) -> (i32, i32) {
    %c0_i32 = arith.constant 0 : i32
    %c0_i32_0 = arith.constant 0 : i32
    %c0_i32_1 = arith.constant 0 : i32
    return %c0_i32, %c0_i32_0 : i32, i32
  }
  func.func @transform_4(%arg0: i32, %arg1: i32) -> (i32, i32) {
    %c0_i32 = arith.constant 0 : i32
    %c0_i32_0 = arith.constant 0 : i32
    %c0_i32_1 = arith.constant 0 : i32
    return %c0_i32, %c0_i32_0 : i32, i32
  }
  func.func @transform_5(%arg0: i32, %arg1: i32) -> (i32, i32) {
    %c0_i32 = arith.constant 0 : i32
    %c0_i32_0 = arith.constant 0 : i32
    return %c0_i32, %arg1 : i32, i32
  }
}

module attributes {stable_mosaic.version = 11 : i64} {
  func.func @_convt_bn_silu_kernel(%arg0: i32, %arg1: i32, %arg2: memref<16x384xbf16, #tpu.memory_space<vmem>>, %arg3: memref<1x256xf32, #tpu.memory_space<vmem>>, %arg4: memref<64x64xbf16, #tpu.memory_space<vmem>>, %arg5: memref<16x1xf32, #tpu.memory_space<vmem>>, %arg6: memref<16x1xf32, #tpu.memory_space<vmem>>, %arg7: memref<64x256xbf16, #tpu.memory_space<vmem>>, %arg8: memref<64x1xf32, #tpu.memory_space<vmem>>, %arg9: memref<64x1xf32, #tpu.memory_space<vmem>>, %arg10: memref<64x1xf32, #tpu.memory_space<vmem>>, %arg11: memref<64x1xf32, #tpu.memory_space<vmem>>) attributes {dimension_semantics = [#tpu.dimension_semantics<arbitrary>, #tpu.dimension_semantics<arbitrary>], iteration_bounds = array<i64: 2, 1>, scalar_prefetch = 0 : i64, scratch_operands = 4 : i64, tpu.core_type = #tpu.core_type<tc>, window_params = [{pipeline_mode = #tpu.pipeline_mode<synchronous>, transform_indices = @transform_0, window_bounds = array<i64: 16, 384>}, {transform_indices = @transform_1, window_bounds = array<i64: 1, 256>}, {pipeline_mode = #tpu.pipeline_mode<synchronous>, transform_indices = @transform_2, window_bounds = array<i64: 64, 64>}, {pipeline_mode = #tpu.pipeline_mode<synchronous>, transform_indices = @transform_3, window_bounds = array<i64: 16, 1>}, {pipeline_mode = #tpu.pipeline_mode<synchronous>, transform_indices = @transform_4, window_bounds = array<i64: 16, 1>}, {transform_indices = @transform_5, window_bounds = array<i64: 64, 256>}]} {
    %c256_i32 = arith.constant 256 : i32
    %0 = arith.muli %arg1, %c256_i32 : i32
    %1 = tpu.assume_multiple %0, 256 : i32
    %c0 = arith.constant 0 : index
    %2 = arith.index_cast %1 : i32 to index
    %3 = vector.load %arg2[%c0, %2] : memref<16x384xbf16, #tpu.memory_space<vmem>>, vector<16x384xbf16>
    %4 = vector.extract_strided_slice %3 {offsets = [0, 0], sizes = [16, 256], strides = [1, 1]} : vector<16x384xbf16> to vector<16x256xbf16>
    %5 = vector.extract_strided_slice %3 {offsets = [0, 1], sizes = [16, 256], strides = [1, 1]} : vector<16x384xbf16> to vector<16x256xbf16>
    %6 = vector.extract_strided_slice %3 {offsets = [0, 9], sizes = [16, 256], strides = [1, 1]} : vector<16x384xbf16> to vector<16x256xbf16>
    %7 = vector.extract_strided_slice %3 {offsets = [0, 10], sizes = [16, 256], strides = [1, 1]} : vector<16x384xbf16> to vector<16x256xbf16>
    %8 = tpu.concatenate %4, %5, %6, %7 in 0 : vector<16x256xbf16>, vector<16x256xbf16>, vector<16x256xbf16>, vector<16x256xbf16> -> vector<64x256xbf16>
    %c0_0 = arith.constant 0 : index
    %c0_1 = arith.constant 0 : index
    %9 = vector.load %arg4[%c0_0, %c0_1] : memref<64x64xbf16, #tpu.memory_space<vmem>>, vector<64x64xbf16>
    %cst = arith.constant dense<0.000000e+00> : vector<64x256xf32>
    %10 = tpu.matmul %9, %8, %cst {dimension_numbers = #tpu.dot_dimension_numbers<[1], [0], [0], [1], [0, 0, 1, 1], [], []>} : vector<64x64xbf16>, vector<64x256xbf16>, vector<64x256xf32> -> vector<64x256xf32>
    %c0_i32 = arith.constant 0 : i32
    %11 = arith.cmpi eq, %arg0, %c0_i32 : i32
    %12 = arith.extui %11 : i1 to i32
    %c0_i32_2 = arith.constant 0 : i32
    %13 = arith.cmpi ne, %12, %c0_i32_2 : i32
    scf.if %13 {
      %c0_i32_4 = arith.constant 0 : i32
      %17 = arith.cmpi eq, %arg1, %c0_i32_4 : i32
      %18 = arith.extui %17 : i1 to i32
      %c0_i32_5 = arith.constant 0 : i32
      %19 = arith.cmpi ne, %18, %c0_i32_5 : i32
      scf.if %19 {
        %cst_20 = arith.constant 0.000000e+00 : f32
        %37 = vector.broadcast %cst_20 : f32 to vector<64x1xf32>
        %c0_21 = arith.constant 0 : index
        %c0_22 = arith.constant 0 : index
        %38 = vector.load %arg8[%c0_21, %c0_22] : memref<64x1xf32, #tpu.memory_space<vmem>>, vector<64x1xf32>
        tpu.vector_store %arg8[%c0_21, %c0_22], %37 {strides = array<i32>} : memref<64x1xf32, #tpu.memory_space<vmem>>, vector<64x1xf32>,
        %cst_23 = arith.constant 0.000000e+00 : f32
        %39 = vector.broadcast %cst_23 : f32 to vector<64x1xf32>
        %c0_24 = arith.constant 0 : index
        %c0_25 = arith.constant 0 : index
        %40 = vector.load %arg9[%c0_24, %c0_25] : memref<64x1xf32, #tpu.memory_space<vmem>>, vector<64x1xf32>
        tpu.vector_store %arg9[%c0_24, %c0_25], %39 {strides = array<i32>} : memref<64x1xf32, #tpu.memory_space<vmem>>, vector<64x1xf32>,
      } else {
      }
      %c0_6 = arith.constant 0 : index
      %c0_7 = arith.constant 0 : index
      %20 = vector.load %arg3[%c0_6, %c0_7] : memref<1x256xf32, #tpu.memory_space<vmem>>, vector<1x256xf32>
      %21 = vector.broadcast %20 : vector<1x256xf32> to vector<64x256xf32>
      %22 = arith.mulf %10, %21 : vector<64x256xf32>
      %c0_8 = arith.constant 0 : index
      %c0_9 = arith.constant 0 : index
      %23 = vector.load %arg8[%c0_8, %c0_9] : memref<64x1xf32, #tpu.memory_space<vmem>>, vector<64x1xf32>
      %cst_10 = arith.constant dense<0.000000e+00> : vector<64xf32>
      %24 = vector.multi_reduction <add>, %22, %cst_10 [1] : vector<64x256xf32> to vector<64xf32>
      %25 = vector.shape_cast %24 : vector<64xf32> to vector<64x1xf32>
      %26 = arith.addf %23, %25 : vector<64x1xf32>
      %c0_11 = arith.constant 0 : index
      %c0_12 = arith.constant 0 : index
      %27 = vector.load %arg8[%c0_11, %c0_12] : memref<64x1xf32, #tpu.memory_space<vmem>>, vector<64x1xf32>
      tpu.vector_store %arg8[%c0_11, %c0_12], %26 {strides = array<i32>} : memref<64x1xf32, #tpu.memory_space<vmem>>, vector<64x1xf32>,
      %c0_13 = arith.constant 0 : index
      %c0_14 = arith.constant 0 : index
      %28 = vector.load %arg9[%c0_13, %c0_14] : memref<64x1xf32, #tpu.memory_space<vmem>>, vector<64x1xf32>
      %29 = arith.mulf %22, %22 : vector<64x256xf32>
      %cst_15 = arith.constant dense<0.000000e+00> : vector<64xf32>
      %30 = vector.multi_reduction <add>, %29, %cst_15 [1] : vector<64x256xf32> to vector<64xf32>
      %31 = vector.shape_cast %30 : vector<64xf32> to vector<64x1xf32>
      %32 = arith.addf %28, %31 : vector<64x1xf32>
      %c0_16 = arith.constant 0 : index
      %c0_17 = arith.constant 0 : index
      %33 = vector.load %arg9[%c0_16, %c0_17] : memref<64x1xf32, #tpu.memory_space<vmem>>, vector<64x1xf32>
      tpu.vector_store %arg9[%c0_16, %c0_17], %32 {strides = array<i32>} : memref<64x1xf32, #tpu.memory_space<vmem>>, vector<64x1xf32>,
      %c0_i32_18 = arith.constant 0 : i32
      %34 = arith.cmpi eq, %arg1, %c0_i32_18 : i32
      %35 = arith.extui %34 : i1 to i32
      %c0_i32_19 = arith.constant 0 : i32
      %36 = arith.cmpi ne, %35, %c0_i32_19 : i32
      scf.if %36 {
        %c0_20 = arith.constant 0 : index
        %c0_21 = arith.constant 0 : index
        %37 = vector.load %arg8[%c0_20, %c0_21] : memref<64x1xf32, #tpu.memory_space<vmem>>, vector<64x1xf32>
        %c0_22 = arith.constant 0 : index
        %c0_23 = arith.constant 0 : index
        %38 = vector.load %arg9[%c0_22, %c0_23] : memref<64x1xf32, #tpu.memory_space<vmem>>, vector<64x1xf32>
        %39 = vector.extract_strided_slice %37 {offsets = [0, 0], sizes = [16, 1], strides = [1, 1]} : vector<64x1xf32> to vector<16x1xf32>
        %40 = vector.extract_strided_slice %37 {offsets = [16, 0], sizes = [16, 1], strides = [1, 1]} : vector<64x1xf32> to vector<16x1xf32>
        %41 = arith.addf %39, %40 : vector<16x1xf32>
        %42 = vector.extract_strided_slice %37 {offsets = [32, 0], sizes = [16, 1], strides = [1, 1]} : vector<64x1xf32> to vector<16x1xf32>
        %43 = arith.addf %41, %42 : vector<16x1xf32>
        %44 = vector.extract_strided_slice %37 {offsets = [48, 0], sizes = [16, 1], strides = [1, 1]} : vector<64x1xf32> to vector<16x1xf32>
        %45 = arith.addf %43, %44 : vector<16x1xf32>
        %46 = vector.extract_strided_slice %38 {offsets = [0, 0], sizes = [16, 1], strides = [1, 1]} : vector<64x1xf32> to vector<16x1xf32>
        %47 = vector.extract_strided_slice %38 {offsets = [16, 0], sizes = [16, 1], strides = [1, 1]} : vector<64x1xf32> to vector<16x1xf32>
        %48 = arith.addf %46, %47 : vector<16x1xf32>
        %49 = vector.extract_strided_slice %38 {offsets = [32, 0], sizes = [16, 1], strides = [1, 1]} : vector<64x1xf32> to vector<16x1xf32>
        %50 = arith.addf %48, %49 : vector<16x1xf32>
        %51 = vector.extract_strided_slice %38 {offsets = [48, 0], sizes = [16, 1], strides = [1, 1]} : vector<64x1xf32> to vector<16x1xf32>
        %52 = arith.addf %50, %51 : vector<16x1xf32>
        %cst_24 = arith.constant 0.001953125 : f32
        %53 = vector.broadcast %cst_24 : f32 to vector<16x1xf32>
        %54 = arith.mulf %45, %53 : vector<16x1xf32>
        %cst_25 = arith.constant 0.001953125 : f32
        %55 = vector.broadcast %cst_25 : f32 to vector<16x1xf32>
        %56 = arith.mulf %52, %55 : vector<16x1xf32>
        %57 = arith.mulf %54, %54 : vector<16x1xf32>
        %58 = arith.subf %56, %57 : vector<16x1xf32>
        %c0_26 = arith.constant 0 : index
        %c0_27 = arith.constant 0 : index
        %59 = vector.load %arg5[%c0_26, %c0_27] : memref<16x1xf32, #tpu.memory_space<vmem>>, vector<16x1xf32>
        %cst_28 = arith.constant 9.99999974E-6 : f32
        %60 = vector.broadcast %cst_28 : f32 to vector<16x1xf32>
        %61 = arith.addf %58, %60 : vector<16x1xf32>
        %62 = math.rsqrt %61 : vector<16x1xf32>
        %63 = arith.mulf %59, %62 : vector<16x1xf32>
        %c0_29 = arith.constant 0 : index
        %c0_30 = arith.constant 0 : index
        %64 = vector.load %arg6[%c0_29, %c0_30] : memref<16x1xf32, #tpu.memory_space<vmem>>, vector<16x1xf32>
        %65 = arith.mulf %54, %63 : vector<16x1xf32>
        %66 = arith.subf %64, %65 : vector<16x1xf32>
        %67 = tpu.concatenate %63, %63, %63, %63 in 0 : vector<16x1xf32>, vector<16x1xf32>, vector<16x1xf32>, vector<16x1xf32> -> vector<64x1xf32>
        %c0_31 = arith.constant 0 : index
        %c0_32 = arith.constant 0 : index
        %68 = vector.load %arg10[%c0_31, %c0_32] : memref<64x1xf32, #tpu.memory_space<vmem>>, vector<64x1xf32>
        tpu.vector_store %arg10[%c0_31, %c0_32], %67 {strides = array<i32>} : memref<64x1xf32, #tpu.memory_space<vmem>>, vector<64x1xf32>,
        %69 = tpu.concatenate %66, %66, %66, %66 in 0 : vector<16x1xf32>, vector<16x1xf32>, vector<16x1xf32>, vector<16x1xf32> -> vector<64x1xf32>
        %c0_33 = arith.constant 0 : index
        %c0_34 = arith.constant 0 : index
        %70 = vector.load %arg11[%c0_33, %c0_34] : memref<64x1xf32, #tpu.memory_space<vmem>>, vector<64x1xf32>
        tpu.vector_store %arg11[%c0_33, %c0_34], %69 {strides = array<i32>} : memref<64x1xf32, #tpu.memory_space<vmem>>, vector<64x1xf32>,
      } else {
      }
    } else {
    }
    %c1_i32 = arith.constant 1 : i32
    %14 = arith.cmpi eq, %arg0, %c1_i32 : i32
    %15 = arith.extui %14 : i1 to i32
    %c0_i32_3 = arith.constant 0 : i32
    %16 = arith.cmpi ne, %15, %c0_i32_3 : i32
    scf.if %16 {
      %c0_4 = arith.constant 0 : index
      %c0_5 = arith.constant 0 : index
      %17 = vector.load %arg10[%c0_4, %c0_5] : memref<64x1xf32, #tpu.memory_space<vmem>>, vector<64x1xf32>
      %18 = vector.broadcast %17 : vector<64x1xf32> to vector<64x256xf32>
      %19 = arith.mulf %10, %18 : vector<64x256xf32>
      %c0_6 = arith.constant 0 : index
      %c0_7 = arith.constant 0 : index
      %20 = vector.load %arg11[%c0_6, %c0_7] : memref<64x1xf32, #tpu.memory_space<vmem>>, vector<64x1xf32>
      %21 = vector.broadcast %20 : vector<64x1xf32> to vector<64x256xf32>
      %22 = arith.addf %19, %21 : vector<64x256xf32>
      %cst_8 = arith.constant 5.000000e-01 : f32
      %23 = vector.broadcast %cst_8 : f32 to vector<64x256xf32>
      %24 = arith.mulf %23, %22 : vector<64x256xf32>
      %cst_9 = arith.constant 5.000000e-01 : f32
      %25 = vector.broadcast %cst_9 : f32 to vector<64x256xf32>
      %26 = arith.mulf %25, %22 : vector<64x256xf32>
      %27 = math.tanh %26 : vector<64x256xf32>
      %cst_10 = arith.constant 1.000000e+00 : f32
      %28 = vector.broadcast %cst_10 : f32 to vector<64x256xf32>
      %29 = arith.addf %28, %27 : vector<64x256xf32>
      %30 = arith.mulf %24, %29 : vector<64x256xf32>
      %31 = arith.truncf %30 : vector<64x256xf32> to vector<64x256xbf16>
      %c0_11 = arith.constant 0 : index
      %c0_12 = arith.constant 0 : index
      %32 = vector.load %arg7[%c0_11, %c0_12] : memref<64x256xbf16, #tpu.memory_space<vmem>>, vector<64x256xbf16>
      tpu.vector_store %arg7[%c0_11, %c0_12], %31 {strides = array<i32>} : memref<64x256xbf16, #tpu.memory_space<vmem>>, vector<64x256xbf16>,
    } else {
    }
    return
  }
  func.func @transform_0(%arg0: i32, %arg1: i32) -> (i32, i32) {
    %c0_i32 = arith.constant 0 : i32
    %c0_i32_0 = arith.constant 0 : i32
    %c0_i32_1 = arith.constant 0 : i32
    return %c0_i32, %c0_i32_0 : i32, i32
  }
  func.func @transform_1(%arg0: i32, %arg1: i32) -> (i32, i32) {
    %c0_i32 = arith.constant 0 : i32
    %c0_i32_0 = arith.constant 0 : i32
    return %c0_i32, %arg1 : i32, i32
  }
  func.func @transform_2(%arg0: i32, %arg1: i32) -> (i32, i32) {
    %c0_i32 = arith.constant 0 : i32
    %c0_i32_0 = arith.constant 0 : i32
    %c0_i32_1 = arith.constant 0 : i32
    return %c0_i32, %c0_i32_0 : i32, i32
  }
  func.func @transform_3(%arg0: i32, %arg1: i32) -> (i32, i32) {
    %c0_i32 = arith.constant 0 : i32
    %c0_i32_0 = arith.constant 0 : i32
    %c0_i32_1 = arith.constant 0 : i32
    return %c0_i32, %c0_i32_0 : i32, i32
  }
  func.func @transform_4(%arg0: i32, %arg1: i32) -> (i32, i32) {
    %c0_i32 = arith.constant 0 : i32
    %c0_i32_0 = arith.constant 0 : i32
    %c0_i32_1 = arith.constant 0 : i32
    return %c0_i32, %c0_i32_0 : i32, i32
  }
  func.func @transform_5(%arg0: i32, %arg1: i32) -> (i32, i32) {
    %c0_i32 = arith.constant 0 : i32
    %c0_i32_0 = arith.constant 0 : i32
    return %c0_i32, %arg1 : i32, i32
  }
}

module attributes {stable_mosaic.version = 11 : i64} {
  func.func @_conv3x3_tanh_kernel(%arg0: i32, %arg1: memref<16x1152xbf16, #tpu.memory_space<vmem>>, %arg2: memref<4x144xbf16, #tpu.memory_space<vmem>>, %arg3: memref<4x1xf32, #tpu.memory_space<vmem>>, %arg4: memref<4x512xf32, #tpu.memory_space<vmem>>) attributes {dimension_semantics = [#tpu.dimension_semantics<parallel>], iteration_bounds = array<i64: 2>, scalar_prefetch = 0 : i64, scratch_operands = 0 : i64, tpu.core_type = #tpu.core_type<tc>, window_params = [{pipeline_mode = #tpu.pipeline_mode<synchronous>, transform_indices = @transform_0, window_bounds = array<i64: 16, 1152>}, {pipeline_mode = #tpu.pipeline_mode<synchronous>, transform_indices = @transform_1, window_bounds = array<i64: 4, 144>}, {pipeline_mode = #tpu.pipeline_mode<synchronous>, transform_indices = @transform_2, window_bounds = array<i64: 4, 1>}, {transform_indices = @transform_3, window_bounds = array<i64: 4, 512>}]} {
    %c512_i32 = arith.constant 512 : i32
    %0 = arith.muli %arg0, %c512_i32 : i32
    %1 = tpu.assume_multiple %0, 512 : i32
    %c0 = arith.constant 0 : index
    %2 = arith.index_cast %1 : i32 to index
    %3 = vector.load %arg1[%c0, %2] : memref<16x1152xbf16, #tpu.memory_space<vmem>>, vector<16x640xbf16>
    %4 = vector.extract_strided_slice %3 {offsets = [0, 0], sizes = [16, 512], strides = [1, 1]} : vector<16x640xbf16> to vector<16x512xbf16>
    %5 = vector.extract_strided_slice %3 {offsets = [0, 1], sizes = [16, 512], strides = [1, 1]} : vector<16x640xbf16> to vector<16x512xbf16>
    %6 = vector.extract_strided_slice %3 {offsets = [0, 2], sizes = [16, 512], strides = [1, 1]} : vector<16x640xbf16> to vector<16x512xbf16>
    %7 = vector.extract_strided_slice %3 {offsets = [0, 18], sizes = [16, 512], strides = [1, 1]} : vector<16x640xbf16> to vector<16x512xbf16>
    %8 = vector.extract_strided_slice %3 {offsets = [0, 19], sizes = [16, 512], strides = [1, 1]} : vector<16x640xbf16> to vector<16x512xbf16>
    %9 = vector.extract_strided_slice %3 {offsets = [0, 20], sizes = [16, 512], strides = [1, 1]} : vector<16x640xbf16> to vector<16x512xbf16>
    %10 = vector.extract_strided_slice %3 {offsets = [0, 36], sizes = [16, 512], strides = [1, 1]} : vector<16x640xbf16> to vector<16x512xbf16>
    %11 = vector.extract_strided_slice %3 {offsets = [0, 37], sizes = [16, 512], strides = [1, 1]} : vector<16x640xbf16> to vector<16x512xbf16>
    %12 = vector.extract_strided_slice %3 {offsets = [0, 38], sizes = [16, 512], strides = [1, 1]} : vector<16x640xbf16> to vector<16x512xbf16>
    %13 = tpu.concatenate %4, %5, %6, %7, %8, %9, %10, %11, %12 in 0 : vector<16x512xbf16>, vector<16x512xbf16>, vector<16x512xbf16>, vector<16x512xbf16>, vector<16x512xbf16>, vector<16x512xbf16>, vector<16x512xbf16>, vector<16x512xbf16>, vector<16x512xbf16> -> vector<144x512xbf16>
    %c0_0 = arith.constant 0 : index
    %c0_1 = arith.constant 0 : index
    %14 = vector.load %arg2[%c0_0, %c0_1] : memref<4x144xbf16, #tpu.memory_space<vmem>>, vector<4x144xbf16>
    %cst = arith.constant dense<0.000000e+00> : vector<4x512xf32>
    %15 = tpu.matmul %14, %13, %cst {dimension_numbers = #tpu.dot_dimension_numbers<[1], [0], [0], [1], [0, 0, 1, 1], [], []>} : vector<4x144xbf16>, vector<144x512xbf16>, vector<4x512xf32> -> vector<4x512xf32>
    %c0_2 = arith.constant 0 : index
    %c0_3 = arith.constant 0 : index
    %16 = vector.load %arg3[%c0_2, %c0_3] : memref<4x1xf32, #tpu.memory_space<vmem>>, vector<4x1xf32>
    %17 = vector.broadcast %16 : vector<4x1xf32> to vector<4x512xf32>
    %18 = arith.addf %15, %17 : vector<4x512xf32>
    %19 = math.tanh %18 : vector<4x512xf32>
    %c0_4 = arith.constant 0 : index
    %c0_5 = arith.constant 0 : index
    %20 = vector.load %arg4[%c0_4, %c0_5] : memref<4x512xf32, #tpu.memory_space<vmem>>, vector<4x512xf32>
    tpu.vector_store %arg4[%c0_4, %c0_5], %19 {strides = array<i32>} : memref<4x512xf32, #tpu.memory_space<vmem>>, vector<4x512xf32>,
    return
  }
  func.func @transform_0(%arg0: i32) -> (i32, i32) {
    %c0_i32 = arith.constant 0 : i32
    %c0_i32_0 = arith.constant 0 : i32
    %c0_i32_1 = arith.constant 0 : i32
    return %c0_i32, %c0_i32_0 : i32, i32
  }
  func.func @transform_1(%arg0: i32) -> (i32, i32) {
    %c0_i32 = arith.constant 0 : i32
    %c0_i32_0 = arith.constant 0 : i32
    %c0_i32_1 = arith.constant 0 : i32
    return %c0_i32, %c0_i32_0 : i32, i32
  }
  func.func @transform_2(%arg0: i32) -> (i32, i32) {
    %c0_i32 = arith.constant 0 : i32
    %c0_i32_0 = arith.constant 0 : i32
    %c0_i32_1 = arith.constant 0 : i32
    return %c0_i32, %c0_i32_0 : i32, i32
  }
  func.func @transform_3(%arg0: i32) -> (i32, i32) {
    %c0_i32 = arith.constant 0 : i32
    %c0_i32_0 = arith.constant 0 : i32
    return %c0_i32, %arg0 : i32, i32
  }
}

</mosaic_0001>

<bundles_post_ra>
// kernel: cnn_variational_decoder_fwd.4
= control target key start
LH: loop header
LB: loop body
LE: loop exit
PB: predicated region body
PF: predicated region fallthrough
CT: control target
= control target key end

     0   :  { %8 = vsyncpa [#allocation3], 0  ;;  %s176_s15 = smov [#allocation2]   ;;  %s209_s0 = inlined_call_operand.vmem [shape: bf16[2,8], index: 0, kind: input, shape index: {}]   ;;  %s210_s1 = inlined_call_operand.hbm [shape: bf16[8,512], index: 1, kind: input, shape index: {}]   ;;  %s211_s2 = inlined_call_operand.vmem [shape: f32[1,512], index: 2, kind: input, shape index: {}]   ;;  %s212_s3 = inlined_call_operand.vmem [shape: bf16[2,512], index: 3, kind: output, shape index: {}]  }
   0x1   :  { %s16_s14 = sshll.u32 %s210_s1, 4  ;;  %s18_s16 = sshll.u32 %s176_s15, 4  ;;  %s17_s14 = int_to_ptr.hbm [resolvable:$true] %s16_s14  ;;  %s19_s16 = int_to_ptr.vmem [resolvable:$true] %s18_s16 }
   0x2   :  { %21 = dma.hbm_to_vmem [thread:$0]  %s17_s14, 256, %s19_s16, [#allocation3]  }
   0x3   :  { %174 = dma.done.wait [#allocation3], 256  }
   0x4   :  { %175 = vsyncadd [#allocation3], 4294967040  ;;  %v30_v0 = vld [vmem:[#allocation2] sm:$0xff]  ;;  %v31_v1 = vld [vmem:[#allocation2 + $0x8] sm:$0xff]  ;;  %vm56_vm0 = vcmask 1043456   ;;  %vm52_vm1 = vcmask 64512  }
   0x5   :  { %v44_v2 = vunpack.c.l.b16 %v30_v0  ;;  %v45_v3 = vunpack.c.h.b16 %v30_v0  ;;  %v46_v4 = vunpack.c.l.b16 %v31_v1  ;;  %v47_v5 = vunpack.c.h.b16 %v31_v1  ;;  %v29_v14 = vld [vmem:[%s209_s0] sm:$0x1] }
   0x6   :  { %v32_v15 = vld [vmem:[%s211_s2] sm:$0xf]  ;;  %vm128_vm2 = vcmask 1040384   ;;  %vm132_vm3 = vcmask 1042434   ;;  %vm136_vm4 = vcmask 1041408  }
   0x7   :  { %v48_v6 = vpack.c.b16 %v44_v2, %v44_v2  ;;  %v49_v7 = vpack.c.b16 %v45_v3, %v45_v3  ;;  %v50_v8 = vpack.c.b16 %v46_v4, %v46_v4  ;;  %v51_v9 = vpack.c.b16 %v47_v5, %v47_v5 }
   0x8   :  { %v34_v16 = vperm.slane %v32_v15, 0  ;;  %v35_v17 = vperm.slane %v32_v15, 1  ;;  %v36_v22 = vperm.slane %v32_v15, 2  ;;  %v37_v23 = vperm.slane %v32_v15, 3 }
   0x9   :  { %v58_v10 = vsel %vm56_vm0, %v48_v6, 0  ;;  %v61_v11 = vsel %vm56_vm0, %v49_v7, 0  ;;  %v64_v12 = vsel %vm56_vm0, %v50_v8, 0  ;;  %v67_v13 = vsel %vm56_vm0, %v51_v9, 0 }
   0xa   :  { %76 = vmatpush.bf16.msra.mxu0 %v58_v10  ;;  %89 = vmatpush.bf16.msra.mxu1 %v61_v11 }
   0xb   :  { %102 = vmatpush.bf16.msra.mxu2 %v64_v12  ;;  %115 = vmatpush.bf16.msra.mxu3 %v67_v13 }
   0xd   :  { %145 = vmatmul.msk.bf16.vlgmr.msra.gmra.mxu0 %vm52_vm1, %v29_v14  ;;  %146 = vmatmul.msk.bf16.vlgmr.msra.gmra.mxu1 %vm52_vm1, %v29_v14 }
   0xe   :  { %147 = vmatmul.msk.bf16.vlgmr.msra.gmra.mxu2 %vm52_vm1, %v29_v14  ;;  %148 = vmatmul.msk.bf16.vlgmr.msra.gmra.mxu3 %vm52_vm1, %v29_v14 }
  0x8a   :  { %v78_v18 = vpop.f32.mrf.mxu0  ;;  %v91_v19 = vpop.f32.mrf.mxu1 }
  0x8b   :  { %v79_v20 = vadd.f32 %v78_v18, %v34_v16  ;;  %v92_v21 = vadd.f32 %v91_v19, %v35_v17 }
  0x8d   :  { %v121_v24 = vpack.c.bf16 %v92_v21, %v79_v20 }
  0x8f   :  { %v125_v31 = vrot.slane %v121_v24, 3 }
  0x91   :  { %v104_v25 = vpop.f32.mrf.mxu2  ;;  %v117_v26 = vpop.f32.mrf.mxu3  ;;  %v131_v35 = vsel %vm128_vm2, %v121_v24, %v125_v31 }
  0x92   :  { %v105_v27 = vadd.f32 %v104_v25, %v36_v22  ;;  %v118_v28 = vadd.f32 %v117_v26, %v37_v23  ;;  %v80_v29 = vpop.f32.mrf.mxu0  ;;  %v93_v30 = vpop.f32.mrf.mxu1 }
  0x94   :  { %v122_v32 = vpack.c.bf16 %v118_v28, %v105_v27 }
  0x96   :  { %v126_v33 = vrot.slane %v122_v32, 6  ;;  %v127_v34 = vrot.slane %v122_v32, 1 }
  0x98   :  { %v135_v36 = vsel %vm132_vm3, %v126_v33, %v127_v34 }
  0x99   :  { %v137_v37 = vsel %vm136_vm4, %v131_v35, %v135_v36  ;;  %v106_v38 = vpop.f32.mrf.mxu2  ;;  %v119_v39 = vpop.f32.mrf.mxu3 }
  0x9a   :  { %139 = vst [vmem:[%s212_s3] sm:$0xf] %v137_v37 }
  0x9b   :  { %144 = vsyncpa [#allocation3], 1 }

// kernel: cnn_variational_decoder_fwd.5
= control target key start
LH: loop header
LB: loop body
LE: loop exit
PB: predicated region body
PF: predicated region fallthrough
CT: control target
= control target key end

     0   :  { %s1002_s18 = smov 0   ;;  %s1004_s19 = smov 0   ;;  %s1194_s0 = inlined_call_operand.vmem [shape: bf16[32,256], index: 0, kind: input, shape index: {}]   ;;  %s1195_s1 = inlined_call_operand.vmem [shape: f32[1,128], index: 1, kind: input, shape index: {}]   ;;  %s1196_s2 = inlined_call_operand.vmem [shape: bf16[64,128], index: 2, kind: input, shape index: {}]   ;;  %s1197_s3 = inlined_call_operand.vmem [shape: f32[16,1], index: 3, kind: input, shape index: {}]   ;;  %s1198_s4 = inlined_call_operand.vmem [shape: f32[16,1], index: 4, kind: input, shape index: {}]   ;;  %s1199_s5 = inlined_call_operand.vmem [shape: bf16[64,128], index: 5, kind: output, shape index: {}]  }
   0x1   :  { %s1006_s20 = smov 0  }
   0x2 LB: > { %s27_s21 = sadd.s32 1, %s961_s19  ;;  %p797_p0 = scmp.ge.s32.totalorder %s965_s20, 1  ;;  %s965_s20 = sphi %s1006_s20, %s15_s20   ;;  %s961_s19 = sphi %s1004_s19, %s1201_s19   ;;  %s957_s18 = sphi %s1002_s18, %s1200_s18  }
   0x3   : > { %p29_p1 = scmp.ge.s32.totalorder %s27_s21, 2  ;;  %p197_p2 = scmp.lt.s32.totalorder %s965_s20, 3 }
   0x5   : > { %s1203_s21 = smov (%p29_p1, %s27_s21), 0  ;;  %p198_p3 = pnand %p797_p0, %p197_p2 }
   0x6   : > { %s967_s30 = smov (!%p198_p3), 122   ;;  %s968_s6 = smov (!%p198_p3), 123  }
   0x7   : > { %201 = sbr.rel (%p198_p3) target bundleno = 702 (0x2be), region = 40  ;;  %s969_s15 = smov (!%p198_p3), 127  }
   0x8   : > { %p830_p4 = scmp.ne.s32.totalorder (!%p198_p3), %s957_s18, 0 }
   0xc   : > { %v804_v0 = vld [vmem:[%s1194_s0 + $0x10] sm:$0xf]  ;;  %v838_v1 = vld [vmem:[%s1194_s0 + $0x14] sm:$0xf0]  ;;  %v800_v3 = vld [vmem:[%s1194_s0] sm:$0xf] }
   0xd   : > { %v1028_v2 = vor.u32 %v838_v1, %v804_v0  ;;  %v836_v4 = vld [vmem:[%s1194_s0 + $0x4] sm:$0xf0]  ;;  %v837_v6 = vld [vmem:[%s1194_s0 + $0x14] sm:$0xf]  ;;  %v810_v7 = vld [vmem:[%s1194_s0 + $0x18] sm:$0xf0] }
   0xe   : > { %v1036_v5 = vor.u32 %v836_v4, %v800_v3  ;;  %v835_v8 = vld [vmem:[%s1194_s0 + $0x4] sm:$0xf]  ;;  %v806_v9 = vld [vmem:[%s1194_s0 + $0x8] sm:$0xf0]  ;;  %v813_v10 = vor.u32 %v837_v6, %v810_v7  ;;  %vm290_vm0 = vcmask 998400   ;;  %vm277_vm1 = vcmask 1006592  }
   0xf   : > { %286 = vrot.lane.b32.xlu0 %v1028_v2, %s967_s30  ;;  %273 = vrot.lane.b32.xlu2 %v1028_v2, %s968_s6  ;;  %v809_v11 = vor.u32 %v835_v8, %v806_v9  ;;  %vm264_vm2 = vcmask 1039360   ;;  %v839_v30 = vld [vmem:[%s1196_s2] sm:$0xff]  ;;  %v840_v31 = vld [vmem:[%s1196_s2 + $0x8] sm:$0xff] }
  0x10   : > { %282 = vrot.lane.b32.xlu1 %v1036_v5, %s967_s30  ;;  %v841_v32 = vld [vmem:[%s1196_s2 + $0x10] sm:$0xff]  ;;  %v842_v33 = vld [vmem:[%s1196_s2 + $0x18] sm:$0xff] }
  0x17   : > { %288 = vrot.lane.b32.xlu0 %v813_v10, %s967_s30  ;;  %275 = vrot.lane.b32.xlu2 %v813_v10, %s968_s6 }
  0x18   : > { %284 = vrot.lane.b32.xlu1 %v809_v11, %s967_s30 }
  0x1f   : > { %269 = vrot.lane.b32.xlu0 %v1036_v5, %s968_s6  ;;  %260 = vrot.lane.b32.xlu2 %v1028_v2, %s969_s15 }
  0x20   : > { %271 = vrot.lane.b32.xlu1 %v809_v11, %s968_s6 }
  0x27   : > { %262 = vrot.lane.b32.xlu0 %v813_v10, %s969_s15  ;;  %258 = vrot.lane.b32.xlu2 %v809_v11, %s969_s15 }
  0x28   : > { %256 = vrot.lane.b32.xlu1 %v1036_v5, %s969_s15 }
  0x69   : > { %v274_v12 = vpop.permute.xlu2 %273 }
  0x71   : > { %v276_v15 = vpop.permute.xlu2 %275 }
  0x72   : > { %v279_v22 = vsel %vm277_vm1, %v274_v12, %v276_v15 }
  0x79   : > { %v261_v20 = vpop.permute.xlu2 %260 }
  0x81   : > { %v287_v13 = vpop.permute.xlu0 %286  ;;  %v259_v26 = vpop.permute.xlu2 %258 }
  0x82   : > { %v283_v14 = vpop.permute.xlu1 %282 }
  0x89   : > { %v289_v16 = vpop.permute.xlu0 %288 }
  0x8a   : > { %v292_v17 = vsel %vm290_vm0, %v287_v13, %v289_v16  ;;  %v285_v18 = vpop.permute.xlu1 %284 }
  0x8b   : > { %327 = vmatpush.bf16.msra.mxu0 %v292_v17  ;;  %866 = vmatpush.bf16.msra.mxu1 %v292_v17  ;;  %v291_v19 = vsel %vm290_vm0, %v283_v14, %v285_v18 }
  0x8c   : > { %867 = vmatpush.bf16.msra.mxu2 %v292_v17  ;;  %868 = vmatpush.bf16.msra.mxu3 %v292_v17 }
  0x8f   : > { %328 = vmatpush.bf16.msra.mxu0 %v291_v19  ;;  %869 = vmatpush.bf16.msra.mxu1 %v291_v19 }
  0x90   : > { %870 = vmatpush.bf16.msra.mxu2 %v291_v19  ;;  %871 = vmatpush.bf16.msra.mxu3 %v291_v19 }
  0x91   : > { %v270_v21 = vpop.permute.xlu0 %269 }
  0x92   : > { %v272_v23 = vpop.permute.xlu1 %271 }
  0x93   : > { %329 = vmatpush.bf16.msra.mxu0 %v279_v22  ;;  %872 = vmatpush.bf16.msra.mxu1 %v279_v22  ;;  %v278_v24 = vsel %vm277_vm1, %v270_v21, %v272_v23 }
  0x94   : > { %873 = vmatpush.bf16.msra.mxu2 %v279_v22  ;;  %874 = vmatpush.bf16.msra.mxu3 %v279_v22 }
  0x97   : > { %330 = vmatpush.bf16.msra.mxu0 %v278_v24  ;;  %875 = vmatpush.bf16.msra.mxu1 %v278_v24 }
  0x98   : > { %876 = vmatpush.bf16.msra.mxu2 %v278_v24  ;;  %877 = vmatpush.bf16.msra.mxu3 %v278_v24 }
  0x99   : > { %v263_v25 = vpop.permute.xlu0 %262 }
  0x9a   : > { %v266_v27 = vsel %vm264_vm2, %v261_v20, %v263_v25  ;;  %v257_v28 = vpop.permute.xlu1 %256 }
  0x9b   : > { %331 = vmatpush.bf16.msra.mxu0 %v266_v27  ;;  %878 = vmatpush.bf16.msra.mxu1 %v266_v27  ;;  %v265_v29 = vsel %vm264_vm2, %v257_v28, %v259_v26 }
  0x9c   : > { %879 = vmatpush.bf16.msra.mxu2 %v266_v27  ;;  %880 = vmatpush.bf16.msra.mxu3 %v266_v27 }
  0x9f   : > { %332 = vmatpush.bf16.msra.mxu0 %v265_v29  ;;  %881 = vmatpush.bf16.msra.mxu1 %v265_v29 }
  0xa0   : > { %882 = vmatpush.bf16.msra.mxu2 %v265_v29  ;;  %883 = vmatpush.bf16.msra.mxu3 %v265_v29 }
  0xa3   : > { %333 = vmatpush.bf16.msra.mxu0 %v1028_v2  ;;  %884 = vmatpush.bf16.msra.mxu1 %v1028_v2 }
  0xa4   : > { %885 = vmatpush.bf16.msra.mxu2 %v1028_v2  ;;  %886 = vmatpush.bf16.msra.mxu3 %v1028_v2 }
  0xa7   : > { %334 = vmatpush.bf16.msra.mxu0 %v1036_v5  ;;  %887 = vmatpush.bf16.msra.mxu1 %v1036_v5 }
  0xa8   : > { %888 = vmatpush.bf16.msra.mxu2 %v1036_v5  ;;  %889 = vmatpush.bf16.msra.mxu3 %v1036_v5 }
  0xaa   : > { %335 = vmatmul.bf16.vlgmr.msra.gmra.mxu0 %v839_v30  ;;  %340 = vmatmul.bf16.vlgmr.msra.gmra.mxu1 %v840_v31 }
  0xab   : > { %345 = vmatmul.bf16.vlgmr.msra.gmra.mxu2 %v841_v32  ;;  %350 = vmatmul.bf16.vlgmr.msra.gmra.mxu3 %v842_v33 }
 0x127   : > { %v1076_v34 = vpop.f32.mrf.mxu0  ;;  %v1078_v35 = vpop.f32.mrf.mxu1 }
 0x12e   : > { %v1080_v36 = vpop.f32.mrf.mxu2  ;;  %v1082_v37 = vpop.f32.mrf.mxu3 }
 0x12f   : > { %v1084_v38 = vpop.f32.mrf.mxu0  ;;  %v1086_v39 = vpop.f32.mrf.mxu1 }
 0x132   : > { %359 = sbr.rel (%p830_p4) target bundleno = 519 (0x207), region = 44 }
 0x136   : > { %v1088_v40 = vpop.f32.mrf.mxu2  ;;  %v1090_v41 = vpop.f32.mrf.mxu3 }
 0x137   : > { %v919_v42 = vld [vmem:[%s1195_s1] ss:$0 sm:$0xff]  ;;  %vm364_vm3 = vcmask 7168   ;;  %v970_v59 = vmov 0.0  }
 0x138   : > { %v389_v43 = vmul.f32 %v919_v42, %v1080_v36  ;;  %v387_v44 = vmul.f32 %v919_v42, %v1078_v35  ;;  %v385_v45 = vmul.f32 %v919_v42, %v1076_v34  ;;  %v390_v46 = vmul.f32 %v919_v42, %v1088_v40  ;;  %369 = vst.msk [vmem:[#allocation2 + $0x20] sm:$0xff] %vm364_vm3, %v970_v59 }
 0x139   : > { %v388_v47 = vmul.f32 %v919_v42, %v1086_v39  ;;  %v386_v48 = vmul.f32 %v919_v42, %v1084_v38  ;;  %v392_v52 = vmul.f32 %v919_v42, %v1090_v41  ;;  %v391_v53 = vmul.f32 %v919_v42, %v1082_v37  ;;  %365 = vst.msk [vmem:[#allocation2] sm:$0xff] %vm364_vm3, %v970_v59 }
 0x13a   : > { %409 = vadd.xlane.f32.xlu2 %v389_v43  ;;  %405 = vadd.xlane.f32.xlu1 %v387_v44  ;;  %v444_v49 = vmul.f32 %v387_v44, %v387_v44  ;;  %v442_v51 = vmul.f32 %v385_v45, %v385_v45  ;;  %v447_v55 = vmul.f32 %v390_v46, %v390_v46 }
 0x13b   : > { %401 = vadd.xlane.f32.xlu0 %v385_v45  ;;  %v443_v50 = vmul.f32 %v386_v48, %v386_v48  ;;  %v445_v54 = vmul.f32 %v388_v47, %v388_v47  ;;  %v448_v56 = vmul.f32 %v391_v53, %v391_v53  ;;  %v446_v57 = vmul.f32 %v389_v43, %v389_v43 }
 0x13c   : > { %v449_v58 = vmul.f32 %v392_v52, %v392_v52  ;;  %366 = vst.msk [vmem:[#allocation2 + $0x8] sm:$0xff] %vm364_vm3, %v970_v59 }
 0x13d   : > { %367 = vst.msk [vmem:[#allocation2 + $0x10] sm:$0xff] %vm364_vm3, %v970_v59 }
 0x13e   : > { %368 = vst.msk [vmem:[#allocation2 + $0x18] sm:$0xff] %vm364_vm3, %v970_v59 }
 0x13f   : > { %370 = vst.msk [vmem:[#allocation2 + $0x28] sm:$0xff] %vm364_vm3, %v970_v59  ;;  %v397_v60 = vld [vmem:[#allocation2 + $0x20] sm:$0xff] }
 0x140   : > { %371 = vst.msk [vmem:[#allocation2 + $0x30] sm:$0xff] %vm364_vm3, %v970_v59  ;;  %v393_v62 = vld [vmem:[#allocation2] sm:$0xff] }
 0x141   : > { %372 = vst.msk [vmem:[#allocation2 + $0x38] sm:$0xff] %vm364_vm3, %v970_v59 }
 0x142   : > { %411 = vadd.xlane.f32.xlu2 %v390_v46  ;;  %407 = vadd.xlane.f32.xlu1 %v388_v47  ;;  %373 = vst.msk [vmem:[#allocation3] sm:$0xff] %vm364_vm3, %v970_v59 }
 0x143   : > { %403 = vadd.xlane.f32.xlu0 %v386_v48  ;;  %374 = vst.msk [vmem:[#allocation3 + $0x8] sm:$0xff] %vm364_vm3, %v970_v59  ;;  %v394_v7 = vld [vmem:[#allocation2 + $0x8] sm:$0xff] }
 0x144   : > { %375 = vst.msk [vmem:[#allocation3 + $0x10] sm:$0xff] %vm364_vm3, %v970_v59  ;;  %v395_v61 = vld [vmem:[#allocation2 + $0x10] sm:$0xff] }
 0x145   : > { %376 = vst.msk [vmem:[#allocation3 + $0x18] sm:$0xff] %vm364_vm3, %v970_v59  ;;  %v396_v6 = vld [vmem:[#allocation2 + $0x18] sm:$0xff] }
 0x146   : > { %377 = vst.msk [vmem:[#allocation3 + $0x20] sm:$0xff] %vm364_vm3, %v970_v59  ;;  %v398_v5 = vld [vmem:[#allocation2 + $0x28] sm:$0xff] }
 0x147   : > { %378 = vst.msk [vmem:[#allocation3 + $0x28] sm:$0xff] %vm364_vm3, %v970_v59  ;;  %v399_v24 = vld [vmem:[#allocation2 + $0x30] sm:$0xff] }
 0x148   : > { %379 = vst.msk [vmem:[#allocation3 + $0x30] sm:$0xff] %vm364_vm3, %v970_v59  ;;  %v400_v23 = vld [vmem:[#allocation2 + $0x38] sm:$0xff] }
 0x149   : > { %380 = vst.msk [vmem:[#allocation3 + $0x38] sm:$0xff] %vm364_vm3, %v970_v59  ;;  %v434_v16 = vld [vmem:[#allocation3] sm:$0xff] }
 0x14a   : > { %454 = vadd.xlane.f32.xlu2 %v444_v49  ;;  %452 = vadd.xlane.f32.xlu1 %v443_v50  ;;  %v435_v15 = vld [vmem:[#allocation3 + $0x8] sm:$0xff] }
 0x14b   : > { %450 = vadd.xlane.f32.xlu0 %v442_v51  ;;  %v436_v14 = vld [vmem:[#allocation3 + $0x10] sm:$0xff] }
 0x14c   : > { %v437_v25 = vld [vmem:[#allocation3 + $0x18] sm:$0xff] }
 0x14d   : > { %v438_v44 = vld [vmem:[#allocation3 + $0x20] sm:$0xff] }
 0x14e   : > { %v439_v32 = vld [vmem:[#allocation3 + $0x28] sm:$0xff] }
 0x14f   : > { %v440_v33 = vld [vmem:[#allocation3 + $0x30] sm:$0xff] }
 0x150   : > { %v441_v59 = vld [vmem:[#allocation3 + $0x38] sm:$0xff] }
 0x152   : > { %415 = vadd.xlane.f32.xlu2 %v392_v52  ;;  %413 = vadd.xlane.f32.xlu1 %v391_v53 }
 0x153   : > { %456 = vadd.xlane.f32.xlu0 %v445_v54 }
 0x15a   : > { %460 = vadd.xlane.f32.xlu1 %v447_v55  ;;  %462 = vadd.xlane.f32.xlu2 %v448_v56 }
 0x15b   : > { %458 = vadd.xlane.f32.xlu0 %v446_v57 }
 0x163   : > { %464 = vadd.xlane.f32.xlu0 %v449_v58 }
 0x1ad   : > { %v410_v63 = vpop.xlane.xlu2 %409  ;;  %v406_v0 = vpop.xlane.xlu1 %405 }
 0x1ae   : > { %v421_v1 = vadd.f32 %v410_v63, %v397_v60  ;;  %v419_v2 = vadd.f32 %v406_v0, %v395_v61  ;;  %v402_v3 = vpop.xlane.xlu0 %401 }
 0x1af   : > { %v417_v4 = vadd.f32 %v402_v3, %v393_v62 }
 0x1b0   : > { %430 = vst.msk [vmem:[#allocation2 + $0x20] sm:$0xff] %vm364_vm3, %v421_v1 }
 0x1b1   : > { %428 = vst.msk [vmem:[#allocation2 + $0x10] sm:$0xff] %vm364_vm3, %v419_v2 }
 0x1b2   : > { %426 = vst.msk [vmem:[#allocation2] sm:$0xff] %vm364_vm3, %v417_v4 }
 0x1b5   : > { %v412_v8 = vpop.xlane.xlu2 %411  ;;  %v408_v9 = vpop.xlane.xlu1 %407 }
 0x1b6   : > { %v422_v10 = vadd.f32 %v412_v8, %v398_v5  ;;  %v420_v11 = vadd.f32 %v408_v9, %v396_v6  ;;  %v404_v12 = vpop.xlane.xlu0 %403 }
 0x1b7   : > { %v418_v13 = vadd.f32 %v404_v12, %v394_v7  ;;  %v489_v52 = vld [vmem:[#allocation2 + $0x20] sm:$0xff] }
 0x1b8   : > { %431 = vst.msk [vmem:[#allocation2 + $0x28] sm:$0xff] %vm364_vm3, %v422_v10  ;;  %v487_v42 = vld [vmem:[#allocation2 + $0x10] sm:$0xff] }
 0x1b9   : > { %429 = vst.msk [vmem:[#allocation2 + $0x18] sm:$0xff] %vm364_vm3, %v420_v11  ;;  %v485_v43 = vld [vmem:[#allocation2] sm:$0xff] }
 0x1ba   : > { %427 = vst.msk [vmem:[#allocation2 + $0x8] sm:$0xff] %vm364_vm3, %v418_v13  ;;  %v501_v50 = vadd.f32 %v487_v42, %v485_v43 }
 0x1bc   : > { %v503_v56 = vadd.f32 %v501_v50, %v489_v52  ;;  %v522_v50 = vld [vmem:[%s1197_s3 + $0x8] sm:$0xff] }
 0x1bd   : > { %v455_v17 = vpop.xlane.xlu2 %454  ;;  %v453_v18 = vpop.xlane.xlu1 %452 }
 0x1be   : > { %v468_v19 = vadd.f32 %v455_v17, %v436_v14  ;;  %v467_v20 = vadd.f32 %v453_v18, %v435_v15  ;;  %v451_v21 = vpop.xlane.xlu0 %450 }
 0x1bf   : > { %v466_v22 = vadd.f32 %v451_v21, %v434_v16  ;;  %v490_v62 = vld [vmem:[#allocation2 + $0x28] sm:$0xff] }
 0x1c0   : > { %476 = vst.msk [vmem:[#allocation3 + $0x10] sm:$0xff] %vm364_vm3, %v468_v19  ;;  %v488_v53 = vld [vmem:[#allocation2 + $0x18] sm:$0xff] }
 0x1c1   : > { %475 = vst.msk [vmem:[#allocation3 + $0x8] sm:$0xff] %vm364_vm3, %v467_v20  ;;  %v486_v54 = vld [vmem:[#allocation2 + $0x8] sm:$0xff] }
 0x1c2   : > { %474 = vst.msk [vmem:[#allocation3] sm:$0xff] %vm364_vm3, %v466_v22  ;;  %v502_v60 = vadd.f32 %v488_v53, %v486_v54 }
 0x1c4   : > { %v504_v4 = vadd.f32 %v502_v60, %v490_v62 }
 0x1c5   : > { %v416_v26 = vpop.xlane.xlu2 %415  ;;  %v414_v27 = vpop.xlane.xlu1 %413 }
 0x1c6   : > { %v424_v28 = vadd.f32 %v416_v26, %v400_v23  ;;  %v423_v29 = vadd.f32 %v414_v27, %v399_v24  ;;  %v457_v30 = vpop.xlane.xlu0 %456 }
 0x1c7   : > { %v469_v31 = vadd.f32 %v457_v30, %v437_v25  ;;  %v495_v57 = vld [vmem:[#allocation3 + $0x10] sm:$0xff] }
 0x1c8   : > { %433 = vst.msk [vmem:[#allocation2 + $0x38] sm:$0xff] %vm364_vm3, %v424_v28  ;;  %v494_v11 = vld [vmem:[#allocation3 + $0x8] sm:$0xff] }
 0x1c9   : > { %432 = vst.msk [vmem:[#allocation2 + $0x30] sm:$0xff] %vm364_vm3, %v423_v29  ;;  %v493_v58 = vld [vmem:[#allocation3] sm:$0xff] }
 0x1ca   : > { %477 = vst.msk [vmem:[#allocation3 + $0x18] sm:$0xff] %vm364_vm3, %v469_v31  ;;  %v507_v0 = vadd.f32 %v495_v57, %v493_v58 }
 0x1cd   : > { %v461_v45 = vpop.xlane.xlu1 %460  ;;  %v463_v46 = vpop.xlane.xlu2 %462 }
 0x1ce   : > { %v471_v47 = vadd.f32 %v461_v45, %v439_v32  ;;  %v459_v48 = vpop.xlane.xlu0 %458  ;;  %v472_v49 = vadd.f32 %v463_v46, %v440_v33  ;;  %v521_v33 = vld [vmem:[%s1197_s3] sm:$0xff] }
 0x1cf   : > { %v470_v51 = vadd.f32 %v459_v48, %v438_v44  ;;  %v492_v2 = vld [vmem:[#allocation2 + $0x38] sm:$0xff] }
 0x1d0   : > { %479 = vst.msk [vmem:[#allocation3 + $0x28] sm:$0xff] %vm364_vm3, %v471_v47  ;;  %v491_v55 = vld [vmem:[#allocation2 + $0x30] sm:$0xff]  ;;  %v506_v9 = vadd.f32 %v504_v4, %v492_v2  ;;  %v547_v47 = vld [vmem:[%s1198_s4] sm:$0xff] }
 0x1d1   : > { %478 = vst.msk [vmem:[#allocation3 + $0x20] sm:$0xff] %vm364_vm3, %v470_v51  ;;  %v505_v61 = vadd.f32 %v503_v56, %v491_v55  ;;  %v496_v8 = vld [vmem:[#allocation3 + $0x18] sm:$0xff]  ;;  %v548_v55 = vld [vmem:[%s1198_s4 + $0x8] sm:$0xff] }
 0x1d2   : > { %480 = vst.msk [vmem:[#allocation3 + $0x30] sm:$0xff] %vm364_vm3, %v472_v49  ;;  %v508_v14 = vadd.f32 %v496_v8, %v494_v11  ;;  %v514_v16 = vmul.f32 0.0078125, %v506_v9 }
 0x1d3   : > { %v513_v5 = vmul.f32 0.0078125, %v505_v61 }
 0x1d4   : > { %v518_v22 = vmul.f32 %v514_v16, %v514_v16 }
 0x1d5   : > { %v517_v13 = vmul.f32 %v513_v5, %v513_v5 }
 0x1d6   : > { %v465_v63 = vpop.xlane.xlu0 %464 }
 0x1d7   : > { %v473_v1 = vadd.f32 %v465_v63, %v441_v59  ;;  %v498_v12 = vld [vmem:[#allocation3 + $0x28] sm:$0xff] }
 0x1d8   : > { %v497_v3 = vld [vmem:[#allocation3 + $0x20] sm:$0xff]  ;;  %v510_v17 = vadd.f32 %v508_v14, %v498_v12 }
 0x1d9   : > { %v509_v6 = vadd.f32 %v507_v0, %v497_v3  ;;  %v499_v7 = vld [vmem:[#allocation3 + $0x30] sm:$0xff]  ;;  %481 = vst.msk [vmem:[#allocation3 + $0x38] sm:$0xff] %vm364_vm3, %v473_v1 }
 0x1db   : > { %v511_v10 = vadd.f32 %v509_v6, %v499_v7 }
 0x1dd   : > { %v515_v15 = vmul.f32 0.0078125, %v511_v10 }
 0x1df   : > { %v519_v18 = vsub.f32 %v515_v15, %v517_v13 }
 0x1e0   : > { %v500_v19 = vld [vmem:[#allocation3 + $0x38] sm:$0xff] }
 0x1e1   : > { %v523_v20 = vadd.f32 1e-05, %v519_v18  ;;  %v512_v21 = vadd.f32 %v510_v17, %v500_v19 }
 0x1e3   : > { %920 = vrsqrt.f32 %v523_v20  ;;  %v516_v23 = vmul.f32 0.0078125, %v512_v21  ;;  %vm531_vm5 = vweird.f32 %v523_v20 }
 0x1e5   : > { %v520_v24 = vsub.f32 %v516_v23, %v518_v22 }
 0x1e7   : > { %v524_v25 = vadd.f32 1e-05, %v520_v24 }
 0x1e9   : > { %v921_v26 = vpop.eup %920  ;;  %922 = vrsqrt.f32 %v524_v25  ;;  %vm541_vm8 = vweird.f32 %v524_v25 }
 0x1ea   : > { %v526_v27 = vmul.f32 %v921_v26, %v523_v20  ;;  %vm532_vm4 = vweird.f32 %v921_v26 }
 0x1eb   : > { %vm533_vm6 = vmor %vm531_vm5, %vm532_vm4 }
 0x1ec   : > { %v527_v28 = vmul.f32 %v921_v26, %v526_v27 }
 0x1ee   : > { %v528_v29 = vmul.f32 0.5, %v527_v28 }
 0x1ef   : > { %v923_v30 = vpop.eup %922 }
 0x1f0   : > { %v529_v31 = vsub.f32 1.5, %v528_v29  ;;  %v536_v32 = vmul.f32 %v923_v30, %v524_v25  ;;  %vm542_vm7 = vweird.f32 %v923_v30 }
 0x1f1   : > { %vm543_vm9 = vmor %vm541_vm8, %vm542_vm7 }
 0x1f2   : > { %v530_v42 = vmul.f32 %v921_v26, %v529_v31  ;;  %v537_v43 = vmul.f32 %v923_v30, %v536_v32 }
 0x1f4   : > { %v534_v44 = vsel %vm533_vm6, %v921_v26, %v530_v42  ;;  %v538_v45 = vmul.f32 0.5, %v537_v43 }
 0x1f5   : > { %v545_v46 = vmul.f32 %v534_v44, %v521_v33 }
 0x1f6   : > { %v539_v48 = vsub.f32 1.5, %v538_v45 }
 0x1f7   : > { %v549_v49 = vmul.f32 %v545_v46, %v513_v5  ;;  %553 = vst.msk [vmem:[#allocation4] sm:$0xff] %vm364_vm3, %v545_v46 }
 0x1f8   : > { %555 = vst.msk [vmem:[#allocation4 + $0x10] sm:$0xff] %vm364_vm3, %v545_v46  ;;  %v540_v51 = vmul.f32 %v923_v30, %v539_v48 }
 0x1f9   : > { %v551_v52 = vsub.f32 %v547_v47, %v549_v49  ;;  %557 = vst.msk [vmem:[#allocation4 + $0x20] sm:$0xff] %vm364_vm3, %v545_v46 }
 0x1fa   : > { %559 = vst.msk [vmem:[#allocation4 + $0x30] sm:$0xff] %vm364_vm3, %v545_v46  ;;  %v544_v53 = vsel %vm543_vm9, %v923_v30, %v540_v51 }
 0x1fb   : > { %561 = vst.msk [vmem:[#allocation5] sm:$0xff] %vm364_vm3, %v551_v52  ;;  %v546_v54 = vmul.f32 %v544_v53, %v522_v50 }
 0x1fc   : > { %563 = vst.msk [vmem:[#allocation5 + $0x10] sm:$0xff] %vm364_vm3, %v551_v52 }
 0x1fd   : > { %565 = vst.msk [vmem:[#allocation5 + $0x20] sm:$0xff] %vm364_vm3, %v551_v52  ;;  %v550_v56 = vmul.f32 %v546_v54, %v514_v16 }
 0x1fe   : > { %567 = vst.msk [vmem:[#allocation5 + $0x30] sm:$0xff] %vm364_vm3, %v551_v52 }
 0x1ff   : > { %v552_v57 = vsub.f32 %v548_v55, %v550_v56  ;;  %554 = vst.msk [vmem:[#allocation4 + $0x8] sm:$0xff] %vm364_vm3, %v546_v54 }
 0x200   : > { %556 = vst.msk [vmem:[#allocation4 + $0x18] sm:$0xff] %vm364_vm3, %v546_v54 }
 0x201   : > { %558 = vst.msk [vmem:[#allocation4 + $0x28] sm:$0xff] %vm364_vm3, %v546_v54 }
 0x202   : > { %560 = vst.msk [vmem:[#allocation4 + $0x38] sm:$0xff] %vm364_vm3, %v546_v54 }
 0x203   : > { %562 = vst.msk [vmem:[#allocation5 + $0x8] sm:$0xff] %vm364_vm3, %v552_v57 }
 0x204   : > { %564 = vst.msk [vmem:[#allocation5 + $0x18] sm:$0xff] %vm364_vm3, %v552_v57 }
 0x205   : > { %566 = vst.msk [vmem:[#allocation5 + $0x28] sm:$0xff] %vm364_vm3, %v552_v57 }
 0x206   : > { %568 = vst.msk [vmem:[#allocation5 + $0x38] sm:$0xff] %vm364_vm3, %v552_v57 }
 0x207 PF: > { %p831_p5 = scmp.ne.s32.totalorder %s957_s18, 1 }
 0x209   : > { %572 = sbr.rel (%p831_p5) target bundleno = 702 (0x2be), region = 56 }
 0x20e   : > { %v577_v58 = vld [vmem:[#allocation4 + $0x20] sm:$0xff]  ;;  %v575_v59 = vld [vmem:[#allocation4 + $0x10] sm:$0xff]  ;;  %v971_v61 = vmov 0   ;;  %v578_v62 = vld [vmem:[#allocation4 + $0x28] sm:$0xff] }
 0x20f   : > { %v573_v60 = vld [vmem:[#allocation4] sm:$0xff]  ;;  %926 = vset.pattern.permute.xlu2 %v971_v61  ;;  %925 = vset.pattern.permute.xlu1 %v971_v61  ;;  %v576_v63 = vld [vmem:[#allocation4 + $0x18] sm:$0xff]  ;;  %v574_v0 = vld [vmem:[#allocation4 + $0x8] sm:$0xff] }
 0x210   : > { %924 = vset.pattern.permute.xlu0 %v971_v61  ;;  %603 = vperm.xlu2 %926, %v577_v58   ;;  %v629_v1 = vld [vmem:[#allocation5] sm:$0xff]  ;;  %v580_v2 = vld [vmem:[#allocation4 + $0x38] sm:$0xff]  ;;  %v579_v3 = vld [vmem:[#allocation4 + $0x30] sm:$0xff] }
 0x211   : > { %593 = vperm.xlu1 %925, %v575_v59   ;;  %583 = vperm.xlu0 %924, %v573_v60   ;;  %v632_v4 = vld [vmem:[#allocation5 + $0x18] sm:$0xff]  ;;  %v631_v5 = vld [vmem:[#allocation5 + $0x10] sm:$0xff]  ;;  %v630_v6 = vld [vmem:[#allocation5 + $0x8] sm:$0xff] }
 0x212   : > { %v635_v7 = vld [vmem:[#allocation5 + $0x30] sm:$0xff]  ;;  %v634_v8 = vld [vmem:[#allocation5 + $0x28] sm:$0xff]  ;;  %v633_v9 = vld [vmem:[#allocation5 + $0x20] sm:$0xff] }
 0x213   : > { %v636_v10 = vld [vmem:[#allocation5 + $0x38] sm:$0xff] }
 0x218   : > { %608 = vperm.xlu2 %926, %v578_v62  }
 0x219   : > { %598 = vperm.xlu1 %925, %v576_v63   ;;  %588 = vperm.xlu0 %924, %v574_v0  }
 0x220   : > { %639 = vperm.xlu2 %926, %v629_v1  }
 0x221   : > { %618 = vperm.xlu1 %925, %v580_v2   ;;  %613 = vperm.xlu0 %924, %v579_v3  }
 0x228   : > { %654 = vperm.xlu2 %926, %v632_v4  }
 0x229   : > { %649 = vperm.xlu1 %925, %v631_v5   ;;  %644 = vperm.xlu0 %924, %v630_v6  }
 0x230   : > { %669 = vperm.xlu2 %926, %v635_v7  }
 0x231   : > { %664 = vperm.xlu1 %925, %v634_v8   ;;  %659 = vperm.xlu0 %924, %v633_v9  }
 0x239   : > { %674 = vperm.xlu0 %924, %v636_v10  }
 0x26a   : > { %v604_v11 = vpop.permute.xlu2 %603 }
 0x26b   : > { %v625_v43 = vmul.f32 %v604_v11, %v1080_v36 }
 0x272   : > { %v609_v12 = vpop.permute.xlu2 %608 }
 0x273   : > { %v626_v44 = vmul.f32 %v609_v12, %v1088_v40 }
 0x27a   : > { %v640_v15 = vpop.permute.xlu2 %639 }
 0x282   : > { %v655_v20 = vpop.permute.xlu2 %654 }
 0x283   : > { %v594_v13 = vpop.permute.xlu1 %593  ;;  %v584_v14 = vpop.permute.xlu0 %583 }
 0x284   : > { %v621_v19 = vmul.f32 %v584_v14, %v1076_v34  ;;  %v623_v27 = vmul.f32 %v594_v13, %v1078_v35 }
 0x286   : > { %v677_v24 = vadd.f32 %v640_v15, %v621_v19 }
 0x288   : > { %v685_v26 = vmul.f32 0.5, %v677_v24 }
 0x28a   : > { %v670_v35 = vpop.permute.xlu2 %669 }
 0x28b   : > { %v599_v16 = vpop.permute.xlu1 %598  ;;  %v589_v17 = vpop.permute.xlu0 %588 }
 0x28c   : > { %v624_v18 = vmul.f32 %v599_v16, %v1086_v39  ;;  %v622_v28 = vmul.f32 %v589_v17, %v1084_v38 }
 0x28e   : > { %v680_v23 = vadd.f32 %v655_v20, %v624_v18 }
 0x290   : > { %v688_v25 = vmul.f32 0.5, %v680_v23 }
 0x292   : > { %927 = vtanh.f32 %v688_v25 }
 0x293   : > { %v619_v21 = vpop.permute.xlu1 %618  ;;  %v614_v22 = vpop.permute.xlu0 %613  ;;  %929 = vtanh.f32 %v685_v26 }
 0x294   : > { %v627_v34 = vmul.f32 %v614_v22, %v1082_v37  ;;  %v628_v59 = vmul.f32 %v619_v21, %v1090_v41 }
 0x296   : > { %v683_v47 = vadd.f32 %v670_v35, %v627_v34 }
 0x298   : > { %v928_v42 = vpop.eup %927  ;;  %v691_v56 = vmul.f32 0.5, %v683_v47 }
 0x299   : > { %v930_v45 = vpop.eup %929  ;;  %v704_v50 = vadd.f32 1.0, %v928_v42 }
 0x29a   : > { %v701_v52 = vadd.f32 1.0, %v930_v45 }
 0x29b   : > { %v650_v29 = vpop.permute.xlu1 %649  ;;  %v645_v30 = vpop.permute.xlu0 %644  ;;  %v712_v36 = vmul.f32 %v704_v50, %v688_v25 }
 0x29c   : > { %v679_v31 = vadd.f32 %v650_v29, %v623_v27  ;;  %v678_v32 = vadd.f32 %v645_v30, %v622_v28  ;;  %v709_v40 = vmul.f32 %v701_v52, %v685_v26 }
 0x29e   : > { %v687_v39 = vmul.f32 0.5, %v679_v31  ;;  %v686_v33 = vmul.f32 0.5, %v678_v32 }
 0x2a0   : > { %931 = vtanh.f32 %v687_v39 }
 0x2a1   : > { %933 = vtanh.f32 %v686_v33 }
 0x2a3   : > { %v665_v38 = vpop.permute.xlu1 %664  ;;  %v660_v46 = vpop.permute.xlu0 %659 }
 0x2a4   : > { %v682_v48 = vadd.f32 %v665_v38, %v626_v44  ;;  %v681_v49 = vadd.f32 %v660_v46, %v625_v43 }
 0x2a6   : > { %v932_v51 = vpop.eup %931  ;;  %v690_v53 = vmul.f32 0.5, %v682_v48  ;;  %v689_v54 = vmul.f32 0.5, %v681_v49 }
 0x2a7   : > { %v934_v37 = vpop.eup %933  ;;  %v703_v55 = vadd.f32 1.0, %v932_v51 }
 0x2a8   : > { %v702_v57 = vadd.f32 1.0, %v934_v37  ;;  %935 = vtanh.f32 %v690_v53 }
 0x2a9   : > { %v711_v58 = vmul.f32 %v703_v55, %v687_v39  ;;  %937 = vtanh.f32 %v689_v54 }
 0x2aa   : > { %v710_v60 = vmul.f32 %v702_v57, %v686_v33  ;;  %939 = vtanh.f32 %v691_v56 }
 0x2ab   : > { %v851_v61 = vpack.c.bf16 %v712_v36, %v711_v58  ;;  %v675_v62 = vpop.permute.xlu0 %674 }
 0x2ac   : > { %v846_v63 = vpack.c.bf16 %v710_v60, %v709_v40  ;;  %v684_v0 = vadd.f32 %v675_v62, %v628_v59 }
 0x2ad   : > { %863 = vst [vmem:[%s1199_s5 + $0x8] sm:$0xff] %v851_v61  }
 0x2ae   : > { %v936_v1 = vpop.eup %935  ;;  %847 = vst [vmem:[%s1199_s5] sm:$0xff] %v846_v63   ;;  %v692_v2 = vmul.f32 0.5, %v684_v0 }
 0x2af   : > { %v938_v3 = vpop.eup %937  ;;  %v706_v4 = vadd.f32 1.0, %v936_v1 }
 0x2b0   : > { %v705_v5 = vadd.f32 1.0, %v938_v3  ;;  %941 = vtanh.f32 %v692_v2  ;;  %v940_v6 = vpop.eup %939 }
 0x2b1   : > { %v714_v41 = vmul.f32 %v706_v4, %v690_v53  ;;  %v707_v9 = vadd.f32 1.0, %v940_v6 }
 0x2b2   : > { %v713_v7 = vmul.f32 %v705_v5, %v689_v54 }
 0x2b3   : > { %v715_v12 = vmul.f32 %v707_v9, %v691_v56 }
 0x2b4   : > { %v856_v8 = vpack.c.bf16 %v714_v41, %v713_v7 }
 0x2b6   : > { %v942_v10 = vpop.eup %941  ;;  %864 = vst [vmem:[%s1199_s5 + $0x10] sm:$0xff] %v856_v8  }
 0x2b7   : > { %v708_v11 = vadd.f32 1.0, %v942_v10 }
 0x2b9   : > { %v716_v13 = vmul.f32 %v708_v11, %v692_v2 }
 0x2bb   : > { %v861_v14 = vpack.c.bf16 %v716_v13, %v715_v12 }
 0x2bd   : > { %865 = vst [vmem:[%s1199_s5 + $0x18] sm:$0xff] %v861_v14  }
 0x2be PF: > { %s15_s20 = sadd.s32 1, %s965_s20   ;;  %s1200_s18 = smov %s961_s19 }
 0x2bf   : > { %p12_p6 = scmp.ge.s32.totalorder %s15_s20, 4   ;;  %s1201_s19 = smov %s1203_s21 }
 0x2c1   :  { %14 = sbr.rel (!%p12_p6) target bundleno = 2 (0x2), region = 87 }

// kernel: cnn_variational_decoder_fwd.6
= control target key start
LH: loop header
LB: loop body
LE: loop exit
PB: predicated region body
PF: predicated region fallthrough
CT: control target
= control target key end

     0   :  { %s1105_s18 = smov 0   ;;  %s1107_s19 = smov 0   ;;  %s1329_s0 = inlined_call_operand.vmem [shape: bf16[16,384], index: 0, kind: input, shape index: {}]   ;;  %s1330_s1 = inlined_call_operand.vmem [shape: f32[1,256], index: 1, kind: input, shape index: {}]   ;;  %s1331_s2 = inlined_call_operand.vmem [shape: bf16[64,64], index: 2, kind: input, shape index: {}]   ;;  %s1332_s3 = inlined_call_operand.vmem [shape: f32[16,1], index: 3, kind: input, shape index: {}]   ;;  %s1333_s4 = inlined_call_operand.vmem [shape: f32[16,1], index: 4, kind: input, shape index: {}]   ;;  %s1334_s5 = inlined_call_operand.vmem [shape: bf16[64,256], index: 5, kind: output, shape index: {}]  }
   0x1   :  { %s1109_s20 = smov 0  }
   0x2 LB: > { %s27_s21 = sadd.s32 1, %s1064_s19  ;;  %p920_p0 = scmp.ge.s32.totalorder %s1068_s20, 1  ;;  %s1068_s20 = sphi %s1109_s20, %s15_s20   ;;  %s1064_s19 = sphi %s1107_s19, %s1336_s19   ;;  %s1060_s18 = sphi %s1105_s18, %s1335_s18  }
   0x3   : > { %p29_p1 = scmp.ge.s32.totalorder %s27_s21, 2  ;;  %p199_p2 = scmp.lt.s32.totalorder %s1068_s20, 3 }
   0x5   : > { %s1338_s21 = smov (%p29_p1, %s27_s21), 0  ;;  %p200_p3 = pnand %p920_p0, %p199_p2 }
   0x6   : > { %s1070_s9 = smov (!%p200_p3), 118   ;;  %s1071_s10 = smov (!%p200_p3), 119  }
   0x7   : > { %203 = sbr.rel (%p200_p3) target bundleno = 708 (0x2c4), region = 40  ;;  %s1072_s11 = smov (!%p200_p3), 127  }
   0x8   : > { %p957_p4 = scmp.ne.s32.totalorder (!%p200_p3), %s1060_s18, 0 }
   0xc   : > { %v931_v0 = vld [vmem:[%s1329_s0 + $0x8] sm:$0xf]  ;;  %v965_v1 = vld [vmem:[%s1329_s0 + $0x10] sm:$0xf0]  ;;  %v923_v3 = vld [vmem:[%s1329_s0] sm:$0xf] }
   0xd   : > { %v932_v2 = vor.u32 %v965_v1, %v931_v0  ;;  %v964_v4 = vld [vmem:[%s1329_s0 + $0x8] sm:$0xf0]  ;;  %v963_v5 = vld [vmem:[%s1329_s0 + $0x4] sm:$0xf]  ;;  %v925_v7 = vld [vmem:[%s1329_s0 + $0xc] sm:$0xf0] }
   0xe   : > { %v924_v6 = vor.u32 %v964_v4, %v923_v3  ;;  %v928_v8 = vor.u32 %v963_v5, %v925_v7  ;;  %vm290_vm0 = vcmask 965632   ;;  %vm279_vm1 = vcmask 973824   ;;  %v966_v24 = vld [vmem:[%s1331_s2] sm:$0xff]  ;;  %v968_v25 = vld [vmem:[%s1331_s2 + $0x10] sm:$0xff]  ;;  %v967_v26 = vld [vmem:[%s1331_s2 + $0x8] sm:$0xff] }
   0xf   : > { %288 = vrot.lane.b32.xlu1 %v932_v2, %s1070_s9  ;;  %vm268_vm2 = vcmask 1039360   ;;  %vm323_vm3 = vcmask 523264   ;;  %v969_v27 = vld [vmem:[%s1331_s2 + $0x18] sm:$0xff] }
  0x10   : > { %284 = vrot.lane.b32.xlu0 %v924_v6, %s1070_s9  ;;  %275 = vrot.lane.b32.xlu2 %v928_v8, %s1071_s10 }
  0x17   : > { %273 = vrot.lane.b32.xlu1 %v924_v6, %s1071_s10 }
  0x18   : > { %286 = vrot.lane.b32.xlu0 %v928_v8, %s1070_s9  ;;  %277 = vrot.lane.b32.xlu2 %v932_v2, %s1071_s10 }
  0x1f   : > { %264 = vrot.lane.b32.xlu1 %v928_v8, %s1072_s11 }
  0x20   : > { %262 = vrot.lane.b32.xlu0 %v924_v6, %s1072_s11  ;;  %266 = vrot.lane.b32.xlu2 %v932_v2, %s1072_s11 }
  0x6a   : > { %v276_v9 = vpop.permute.xlu2 %275 }
  0x72   : > { %v278_v12 = vpop.permute.xlu2 %277 }
  0x73   : > { %v281_v19 = vsel %vm279_vm1, %v276_v9, %v278_v12 }
  0x7a   : > { %v267_v18 = vpop.permute.xlu2 %266 }
  0x81   : > { %v289_v10 = vpop.permute.xlu1 %288 }
  0x82   : > { %v285_v11 = vpop.permute.xlu0 %284 }
  0x89   : > { %v274_v13 = vpop.permute.xlu1 %273 }
  0x8a   : > { %v287_v14 = vpop.permute.xlu0 %286  ;;  %v280_v17 = vsel %vm279_vm1, %v274_v13, %v276_v9 }
  0x8b   : > { %v291_v15 = vsel %vm290_vm0, %v285_v11, %v287_v14  ;;  %v292_v16 = vsel %vm290_vm0, %v287_v14, %v289_v10 }
  0x8c   : > { %340 = vmatpush.bf16.msra.mxu0 %v291_v15  ;;  %970 = vmatpush.bf16.msra.mxu2 %v291_v15 }
  0x8d   : > { %369 = vmatpush.bf16.msra.mxu1 %v292_v16  ;;  %974 = vmatpush.bf16.msra.mxu3 %v292_v16 }
  0x90   : > { %341 = vmatpush.bf16.msra.mxu0 %v280_v17  ;;  %971 = vmatpush.bf16.msra.mxu2 %v280_v17 }
  0x91   : > { %370 = vmatpush.bf16.msra.mxu1 %v281_v19  ;;  %975 = vmatpush.bf16.msra.mxu3 %v281_v19  ;;  %v265_v20 = vpop.permute.xlu1 %264 }
  0x92   : > { %v263_v21 = vpop.permute.xlu0 %262  ;;  %v270_v22 = vsel %vm268_vm2, %v265_v20, %v267_v18 }
  0x93   : > { %v269_v23 = vsel %vm268_vm2, %v263_v21, %v265_v20 }
  0x94   : > { %342 = vmatpush.bf16.msra.mxu0 %v269_v23  ;;  %972 = vmatpush.bf16.msra.mxu2 %v269_v23 }
  0x95   : > { %371 = vmatpush.bf16.msra.mxu1 %v270_v22  ;;  %976 = vmatpush.bf16.msra.mxu3 %v270_v22 }
  0x98   : > { %343 = vmatpush.bf16.msra.mxu0 %v924_v6  ;;  %973 = vmatpush.bf16.msra.mxu2 %v924_v6 }
  0x99   : > { %372 = vmatpush.bf16.msra.mxu1 %v928_v8  ;;  %977 = vmatpush.bf16.msra.mxu3 %v928_v8 }
  0x9b   : > { %949 = vmatmul.msk.bf16.vlgmr.msra.gmra.mxu0 %vm323_vm3, %v966_v24  ;;  %951 = vmatmul.msk.bf16.vlgmr.msra.gmra.mxu2 %vm323_vm3, %v968_v25 }
  0x9c   : > { %953 = vmatmul.msk.bf16.vlgmr.msra.gmra.mxu1 %vm323_vm3, %v966_v24  ;;  %955 = vmatmul.msk.bf16.vlgmr.msra.gmra.mxu3 %vm323_vm3, %v968_v25 }
  0xab   : > { %950 = vmatmul.msk.bf16.gmra.mxu0 %vm323_vm3, %v967_v26  ;;  %952 = vmatmul.msk.bf16.gmra.mxu2 %vm323_vm3, %v969_v27 }
  0xac   : > { %954 = vmatmul.msk.bf16.gmra.mxu1 %vm323_vm3, %v967_v26  ;;  %956 = vmatmul.msk.bf16.gmra.mxu3 %vm323_vm3, %v969_v27 }
 0x118   : > { %v1155_v28 = vpop.f32.mrf.mxu0 }
 0x119   : > { %v1157_v29 = vpop.f32.mrf.mxu1 }
 0x11e   : > { %v1159_v30 = vpop.f32.mrf.mxu2 }
 0x11f   : > { %v1161_v31 = vpop.f32.mrf.mxu3 }
 0x120   : > { %v1163_v32 = vpop.f32.mrf.mxu0 }
 0x121   : > { %v1165_v33 = vpop.f32.mrf.mxu1 }
 0x126   : > { %v1167_v34 = vpop.f32.mrf.mxu2 }
 0x127   : > { %v1169_v35 = vpop.f32.mrf.mxu3 }
 0x128   : > { %v1171_v36 = vpop.f32.mrf.mxu0 }
 0x129   : > { %v1173_v37 = vpop.f32.mrf.mxu1 }
 0x12e   : > { %v1175_v38 = vpop.f32.mrf.mxu2 }
 0x12f   : > { %v1177_v39 = vpop.f32.mrf.mxu3 }
 0x130   : > { %v1179_v40 = vpop.f32.mrf.mxu0 }
 0x131   : > { %v1181_v41 = vpop.f32.mrf.mxu1 }
 0x133   : > { %397 = sbr.rel (%p957_p4) target bundleno = 524 (0x20c), region = 44 }
 0x136   : > { %v1183_v42 = vpop.f32.mrf.mxu2 }
 0x137   : > { %v1185_v43 = vpop.f32.mrf.mxu3 }
 0x138   : > { %v419_v44 = vld [vmem:[%s1330_s1] sm:$0x3]  ;;  %vm402_vm4 = vcmask 7168  }
 0x139   : > { %v421_v45 = vperm.slane %v419_v44, 0  ;;  %v422_v46 = vperm.slane %v419_v44, 1 }
 0x13b   : > { %v433_v47 = vmul.f32 %v421_v45, %v1159_v30  ;;  %v434_v48 = vmul.f32 %v422_v46, %v1161_v31  ;;  %v429_v49 = vmul.f32 %v421_v45, %v1171_v36  ;;  %v430_v50 = vmul.f32 %v422_v46, %v1173_v37 }
 0x13c   : > { %v425_v51 = vmul.f32 %v421_v45, %v1155_v28  ;;  %v426_v52 = vmul.f32 %v422_v46, %v1157_v29  ;;  %v435_v56 = vmul.f32 %v421_v45, %v1167_v34  ;;  %v436_v57 = vmul.f32 %v422_v46, %v1169_v35 }
 0x13d   : > { %v461_v53 = vadd.f32 %v434_v48, %v433_v47  ;;  %v455_v54 = vadd.f32 %v430_v50, %v429_v49  ;;  %v431_v58 = vmul.f32 %v421_v45, %v1179_v40  ;;  %v432_v59 = vmul.f32 %v422_v46, %v1181_v41 }
 0x13e   : > { %v449_v55 = vadd.f32 %v426_v52, %v425_v51  ;;  %v427_v60 = vmul.f32 %v421_v45, %v1163_v32  ;;  %v428_v61 = vmul.f32 %v422_v46, %v1165_v33  ;;  %v464_v62 = vadd.f32 %v436_v57, %v435_v56 }
 0x13f   : > { %462 = vadd.xlane.f32.xlu2 %v461_v53  ;;  %456 = vadd.xlane.f32.xlu1 %v455_v54  ;;  %v458_v63 = vadd.f32 %v432_v59, %v431_v58  ;;  %v502_v1 = vmul.f32 %v429_v49, %v429_v49  ;;  %v503_v2 = vmul.f32 %v430_v50, %v430_v50  ;;  %v1073_v49 = vmov 0.0  }
 0x140   : > { %450 = vadd.xlane.f32.xlu0 %v449_v55  ;;  %v452_v0 = vadd.f32 %v428_v61, %v427_v60  ;;  %v500_v3 = vmul.f32 %v427_v60, %v427_v60  ;;  %v501_v4 = vmul.f32 %v428_v61, %v428_v61  ;;  %v498_v5 = vmul.f32 %v425_v51, %v425_v51 }
 0x141   : > { %v499_v6 = vmul.f32 %v426_v52, %v426_v52  ;;  %v520_v7 = vadd.f32 %v503_v2, %v502_v1  ;;  %v439_v10 = vmul.f32 %v421_v45, %v1183_v42  ;;  %v440_v11 = vmul.f32 %v422_v46, %v1185_v43  ;;  %407 = vst.msk [vmem:[#allocation2 + $0x20] sm:$0xff] %vm402_vm4, %v1073_v49 }
 0x142   : > { %v517_v8 = vadd.f32 %v501_v4, %v500_v3  ;;  %v437_v12 = vmul.f32 %v421_v45, %v1175_v38  ;;  %v438_v13 = vmul.f32 %v422_v46, %v1177_v39  ;;  %v504_v14 = vmul.f32 %v431_v58, %v431_v58  ;;  %403 = vst.msk [vmem:[#allocation2] sm:$0xff] %vm402_vm4, %v1073_v49 }
 0x143   : > { %v514_v9 = vadd.f32 %v499_v6, %v498_v5  ;;  %v505_v15 = vmul.f32 %v432_v59, %v432_v59  ;;  %v470_v16 = vadd.f32 %v440_v11, %v439_v10  ;;  %v508_v19 = vmul.f32 %v435_v56, %v435_v56  ;;  %404 = vst.msk [vmem:[#allocation2 + $0x8] sm:$0xff] %vm402_vm4, %v1073_v49 }
 0x144   : > { %v467_v17 = vadd.f32 %v438_v13, %v437_v12  ;;  %v509_v20 = vmul.f32 %v436_v57, %v436_v57  ;;  %v510_v21 = vmul.f32 %v437_v12, %v437_v12  ;;  %v511_v22 = vmul.f32 %v438_v13, %v438_v13  ;;  %405 = vst.msk [vmem:[#allocation2 + $0x10] sm:$0xff] %vm402_vm4, %v1073_v49 }
 0x145   : > { %v523_v18 = vadd.f32 %v505_v15, %v504_v14  ;;  %v506_v23 = vmul.f32 %v433_v47, %v433_v47  ;;  %v507_v24 = vmul.f32 %v434_v48, %v434_v48  ;;  %v512_v44 = vmul.f32 %v439_v10, %v439_v10  ;;  %406 = vst.msk [vmem:[#allocation2 + $0x18] sm:$0xff] %vm402_vm4, %v1073_v49 }
 0x146   : > { %v529_v25 = vadd.f32 %v509_v20, %v508_v19  ;;  %v532_v26 = vadd.f32 %v511_v22, %v510_v21  ;;  %v513_v45 = vmul.f32 %v440_v11, %v440_v11  ;;  %408 = vst.msk [vmem:[#allocation2 + $0x28] sm:$0xff] %vm402_vm4, %v1073_v49 }
 0x147   : > { %465 = vadd.xlane.f32.xlu2 %v464_v62  ;;  %459 = vadd.xlane.f32.xlu1 %v458_v63  ;;  %v526_v27 = vadd.f32 %v507_v24, %v506_v23  ;;  %409 = vst.msk [vmem:[#allocation2 + $0x30] sm:$0xff] %vm402_vm4, %v1073_v49 }
 0x148   : > { %453 = vadd.xlane.f32.xlu0 %v452_v0  ;;  %v535_v46 = vadd.f32 %v513_v45, %v512_v44  ;;  %410 = vst.msk [vmem:[#allocation2 + $0x38] sm:$0xff] %vm402_vm4, %v1073_v49  ;;  %v445_v47 = vld [vmem:[#allocation2 + $0x20] sm:$0xff] }
 0x149   : > { %411 = vst.msk [vmem:[#allocation3] sm:$0xff] %vm402_vm4, %v1073_v49  ;;  %v441_v50 = vld [vmem:[#allocation2] sm:$0xff] }
 0x14a   : > { %412 = vst.msk [vmem:[#allocation3 + $0x8] sm:$0xff] %vm402_vm4, %v1073_v49  ;;  %v442_v59 = vld [vmem:[#allocation2 + $0x8] sm:$0xff] }
 0x14b   : > { %413 = vst.msk [vmem:[#allocation3 + $0x10] sm:$0xff] %vm402_vm4, %v1073_v49  ;;  %v443_v48 = vld [vmem:[#allocation2 + $0x10] sm:$0xff] }
 0x14c   : > { %414 = vst.msk [vmem:[#allocation3 + $0x18] sm:$0xff] %vm402_vm4, %v1073_v49  ;;  %v444_v58 = vld [vmem:[#allocation2 + $0x18] sm:$0xff] }
 0x14d   : > { %415 = vst.msk [vmem:[#allocation3 + $0x20] sm:$0xff] %vm402_vm4, %v1073_v49  ;;  %v446_v57 = vld [vmem:[#allocation2 + $0x28] sm:$0xff] }
 0x14e   : > { %416 = vst.msk [vmem:[#allocation3 + $0x28] sm:$0xff] %vm402_vm4, %v1073_v49  ;;  %v447_v12 = vld [vmem:[#allocation2 + $0x30] sm:$0xff] }
 0x14f   : > { %521 = vadd.xlane.f32.xlu2 %v520_v7  ;;  %518 = vadd.xlane.f32.xlu1 %v517_v8  ;;  %417 = vst.msk [vmem:[#allocation3 + $0x30] sm:$0xff] %vm402_vm4, %v1073_v49  ;;  %v448_v11 = vld [vmem:[#allocation2 + $0x38] sm:$0xff] }
 0x150   : > { %515 = vadd.xlane.f32.xlu0 %v514_v9  ;;  %418 = vst.msk [vmem:[#allocation3 + $0x38] sm:$0xff] %vm402_vm4, %v1073_v49  ;;  %v490_v4 = vld [vmem:[#allocation3] sm:$0xff] }
 0x151   : > { %v491_v3 = vld [vmem:[#allocation3 + $0x8] sm:$0xff] }
 0x152   : > { %v492_v2 = vld [vmem:[#allocation3 + $0x10] sm:$0xff] }
 0x153   : > { %v493_v13 = vld [vmem:[#allocation3 + $0x18] sm:$0xff] }
 0x154   : > { %v494_v24 = vld [vmem:[#allocation3 + $0x20] sm:$0xff] }
 0x155   : > { %v495_v20 = vld [vmem:[#allocation3 + $0x28] sm:$0xff] }
 0x156   : > { %v496_v21 = vld [vmem:[#allocation3 + $0x30] sm:$0xff] }
 0x157   : > { %471 = vadd.xlane.f32.xlu2 %v470_v16  ;;  %468 = vadd.xlane.f32.xlu1 %v467_v17 }
 0x158   : > { %524 = vadd.xlane.f32.xlu0 %v523_v18 }
 0x15f   : > { %530 = vadd.xlane.f32.xlu1 %v529_v25  ;;  %533 = vadd.xlane.f32.xlu2 %v532_v26 }
 0x160   : > { %527 = vadd.xlane.f32.xlu0 %v526_v27 }
 0x168   : > { %536 = vadd.xlane.f32.xlu0 %v535_v46 }
 0x1b2   : > { %v463_v51 = vpop.xlane.xlu2 %462  ;;  %v457_v52 = vpop.xlane.xlu1 %456 }
 0x1b3   : > { %v477_v53 = vadd.f32 %v463_v51, %v445_v47  ;;  %v475_v54 = vadd.f32 %v457_v52, %v443_v48  ;;  %v451_v55 = vpop.xlane.xlu0 %450 }
 0x1b4   : > { %v473_v56 = vadd.f32 %v451_v55, %v441_v50  ;;  %v497_v55 = vld [vmem:[#allocation3 + $0x38] sm:$0xff] }
 0x1b5   : > { %486 = vst.msk [vmem:[#allocation2 + $0x20] sm:$0xff] %vm402_vm4, %v477_v53 }
 0x1b6   : > { %484 = vst.msk [vmem:[#allocation2 + $0x10] sm:$0xff] %vm402_vm4, %v475_v54 }
 0x1b7   : > { %482 = vst.msk [vmem:[#allocation2] sm:$0xff] %vm402_vm4, %v473_v56 }
 0x1ba   : > { %v466_v60 = vpop.xlane.xlu2 %465  ;;  %v460_v61 = vpop.xlane.xlu1 %459 }
 0x1bb   : > { %v478_v62 = vadd.f32 %v466_v60, %v446_v57  ;;  %v476_v63 = vadd.f32 %v460_v61, %v444_v58  ;;  %v454_v0 = vpop.xlane.xlu0 %453 }
 0x1bc   : > { %v474_v1 = vadd.f32 %v454_v0, %v442_v59  ;;  %v561_v47 = vld [vmem:[#allocation2 + $0x20] sm:$0xff] }
 0x1bd   : > { %487 = vst.msk [vmem:[#allocation2 + $0x28] sm:$0xff] %vm402_vm4, %v478_v62  ;;  %v559_v22 = vld [vmem:[#allocation2 + $0x10] sm:$0xff] }
 0x1be   : > { %485 = vst.msk [vmem:[#allocation2 + $0x18] sm:$0xff] %vm402_vm4, %v476_v63  ;;  %v557_v23 = vld [vmem:[#allocation2] sm:$0xff] }
 0x1bf   : > { %483 = vst.msk [vmem:[#allocation2 + $0x8] sm:$0xff] %vm402_vm4, %v474_v1  ;;  %v573_v46 = vadd.f32 %v559_v22, %v557_v23 }
 0x1c1   : > { %v575_v52 = vadd.f32 %v573_v46, %v561_v47 }
 0x1c2   : > { %v522_v5 = vpop.xlane.xlu2 %521  ;;  %v519_v6 = vpop.xlane.xlu1 %518 }
 0x1c3   : > { %v540_v7 = vadd.f32 %v522_v5, %v492_v2  ;;  %v539_v8 = vadd.f32 %v519_v6, %v491_v3  ;;  %v516_v9 = vpop.xlane.xlu0 %515 }
 0x1c4   : > { %v538_v10 = vadd.f32 %v516_v9, %v490_v4  ;;  %v562_v58 = vld [vmem:[#allocation2 + $0x28] sm:$0xff] }
 0x1c5   : > { %548 = vst.msk [vmem:[#allocation3 + $0x10] sm:$0xff] %vm402_vm4, %v540_v7  ;;  %v560_v48 = vld [vmem:[#allocation2 + $0x18] sm:$0xff] }
 0x1c6   : > { %547 = vst.msk [vmem:[#allocation3 + $0x8] sm:$0xff] %vm402_vm4, %v539_v8  ;;  %v558_v50 = vld [vmem:[#allocation2 + $0x8] sm:$0xff] }
 0x1c7   : > { %546 = vst.msk [vmem:[#allocation3] sm:$0xff] %vm402_vm4, %v538_v10  ;;  %v574_v56 = vadd.f32 %v560_v48, %v558_v50 }
 0x1c9   : > { %v576_v0 = vadd.f32 %v574_v56, %v562_v58 }
 0x1ca   : > { %v472_v14 = vpop.xlane.xlu2 %471  ;;  %v469_v15 = vpop.xlane.xlu1 %468 }
 0x1cb   : > { %v480_v16 = vadd.f32 %v472_v14, %v448_v11  ;;  %v479_v17 = vadd.f32 %v469_v15, %v447_v12  ;;  %v525_v18 = vpop.xlane.xlu0 %524 }
 0x1cc   : > { %v541_v19 = vadd.f32 %v525_v18, %v493_v13  ;;  %v567_v53 = vld [vmem:[#allocation3 + $0x10] sm:$0xff] }
 0x1cd   : > { %489 = vst.msk [vmem:[#allocation2 + $0x38] sm:$0xff] %vm402_vm4, %v480_v16  ;;  %v566_v7 = vld [vmem:[#allocation3 + $0x8] sm:$0xff] }
 0x1ce   : > { %488 = vst.msk [vmem:[#allocation2 + $0x30] sm:$0xff] %vm402_vm4, %v479_v17  ;;  %v565_v54 = vld [vmem:[#allocation3] sm:$0xff] }
 0x1cf   : > { %549 = vst.msk [vmem:[#allocation3 + $0x18] sm:$0xff] %vm402_vm4, %v541_v19  ;;  %v579_v60 = vadd.f32 %v567_v53, %v565_v54  ;;  %v594_v54 = vld [vmem:[%s1332_s3 + $0x8] sm:$0xff] }
 0x1d2   : > { %v531_v25 = vpop.xlane.xlu1 %530  ;;  %v534_v26 = vpop.xlane.xlu2 %533 }
 0x1d3   : > { %v543_v27 = vadd.f32 %v531_v25, %v495_v20  ;;  %v528_v44 = vpop.xlane.xlu0 %527  ;;  %v544_v45 = vadd.f32 %v534_v26, %v496_v21 }
 0x1d4   : > { %v542_v49 = vadd.f32 %v528_v44, %v494_v24  ;;  %v564_v62 = vld [vmem:[#allocation2 + $0x38] sm:$0xff] }
 0x1d5   : > { %551 = vst.msk [vmem:[#allocation3 + $0x28] sm:$0xff] %vm402_vm4, %v543_v27  ;;  %v563_v51 = vld [vmem:[#allocation2 + $0x30] sm:$0xff]  ;;  %v578_v5 = vadd.f32 %v576_v0, %v564_v62 }
 0x1d6   : > { %550 = vst.msk [vmem:[#allocation3 + $0x20] sm:$0xff] %vm402_vm4, %v542_v49  ;;  %v577_v57 = vadd.f32 %v575_v52, %v563_v51  ;;  %v568_v4 = vld [vmem:[#allocation3 + $0x18] sm:$0xff]  ;;  %v619_v51 = vld [vmem:[%s1333_s4] sm:$0xff] }
 0x1d7   : > { %552 = vst.msk [vmem:[#allocation3 + $0x30] sm:$0xff] %vm402_vm4, %v544_v45  ;;  %v580_v10 = vadd.f32 %v568_v4, %v566_v7  ;;  %v586_v12 = vmul.f32 0.001953125, %v578_v5  ;;  %v593_v45 = vld [vmem:[%s1332_s3] sm:$0xff] }
 0x1d8   : > { %v585_v1 = vmul.f32 0.001953125, %v577_v57 }
 0x1d9   : > { %v590_v18 = vmul.f32 %v586_v12, %v586_v12 }
 0x1da   : > { %v589_v9 = vmul.f32 %v585_v1, %v585_v1 }
 0x1db   : > { %v537_v59 = vpop.xlane.xlu0 %536 }
 0x1dc   : > { %v545_v61 = vadd.f32 %v537_v59, %v497_v55  ;;  %v570_v8 = vld [vmem:[#allocation3 + $0x28] sm:$0xff] }
 0x1dd   : > { %v569_v63 = vld [vmem:[#allocation3 + $0x20] sm:$0xff]  ;;  %v582_v13 = vadd.f32 %v580_v10, %v570_v8  ;;  %v620_v59 = vld [vmem:[%s1333_s4 + $0x8] sm:$0xff] }
 0x1de   : > { %v581_v2 = vadd.f32 %v579_v60, %v569_v63  ;;  %v571_v3 = vld [vmem:[#allocation3 + $0x30] sm:$0xff]  ;;  %553 = vst.msk [vmem:[#allocation3 + $0x38] sm:$0xff] %vm402_vm4, %v545_v61 }
 0x1e0   : > { %v583_v6 = vadd.f32 %v581_v2, %v571_v3 }
 0x1e2   : > { %v587_v11 = vmul.f32 0.001953125, %v583_v6 }
 0x1e4   : > { %v591_v14 = vsub.f32 %v587_v11, %v589_v9 }
 0x1e5   : > { %v572_v15 = vld [vmem:[#allocation3 + $0x38] sm:$0xff] }
 0x1e6   : > { %v595_v16 = vadd.f32 1e-05, %v591_v14  ;;  %v584_v17 = vadd.f32 %v582_v13, %v572_v15 }
 0x1e8   : > { %1007 = vrsqrt.f32 %v595_v16  ;;  %v588_v19 = vmul.f32 0.001953125, %v584_v17  ;;  %vm603_vm6 = vweird.f32 %v595_v16 }
 0x1ea   : > { %v592_v20 = vsub.f32 %v588_v19, %v590_v18 }
 0x1ec   : > { %v596_v21 = vadd.f32 1e-05, %v592_v20 }
 0x1ee   : > { %v1008_v22 = vpop.eup %1007  ;;  %1009 = vrsqrt.f32 %v596_v21  ;;  %vm613_vm9 = vweird.f32 %v596_v21 }
 0x1ef   : > { %v598_v23 = vmul.f32 %v1008_v22, %v595_v16  ;;  %vm604_vm5 = vweird.f32 %v1008_v22 }
 0x1f0   : > { %vm605_vm7 = vmor %vm603_vm6, %vm604_vm5 }
 0x1f1   : > { %v599_v24 = vmul.f32 %v1008_v22, %v598_v23 }
 0x1f3   : > { %v600_v25 = vmul.f32 0.5, %v599_v24 }
 0x1f4   : > { %v1010_v26 = vpop.eup %1009 }
 0x1f5   : > { %v601_v27 = vsub.f32 1.5, %v600_v25  ;;  %v608_v44 = vmul.f32 %v1010_v26, %v596_v21  ;;  %vm614_vm8 = vweird.f32 %v1010_v26 }
 0x1f6   : > { %vm615_vm10 = vmor %vm613_vm9, %vm614_vm8 }
 0x1f7   : > { %v602_v46 = vmul.f32 %v1008_v22, %v601_v27  ;;  %v609_v49 = vmul.f32 %v1010_v26, %v608_v44 }
 0x1f9   : > { %v606_v47 = vsel %vm605_vm7, %v1008_v22, %v602_v46  ;;  %v610_v48 = vmul.f32 0.5, %v609_v49 }
 0x1fa   : > { %v617_v50 = vmul.f32 %v606_v47, %v593_v45 }
 0x1fb   : > { %v611_v52 = vsub.f32 1.5, %v610_v48 }
 0x1fc   : > { %v621_v53 = vmul.f32 %v617_v50, %v585_v1  ;;  %625 = vst.msk [vmem:[#allocation4] sm:$0xff] %vm402_vm4, %v617_v50 }
 0x1fd   : > { %627 = vst.msk [vmem:[#allocation4 + $0x10] sm:$0xff] %vm402_vm4, %v617_v50  ;;  %v612_v55 = vmul.f32 %v1010_v26, %v611_v52 }
 0x1fe   : > { %v623_v56 = vsub.f32 %v619_v51, %v621_v53  ;;  %629 = vst.msk [vmem:[#allocation4 + $0x20] sm:$0xff] %vm402_vm4, %v617_v50 }
 0x1ff   : > { %631 = vst.msk [vmem:[#allocation4 + $0x30] sm:$0xff] %vm402_vm4, %v617_v50  ;;  %v616_v57 = vsel %vm615_vm10, %v1010_v26, %v612_v55 }
 0x200   : > { %633 = vst.msk [vmem:[#allocation5] sm:$0xff] %vm402_vm4, %v623_v56  ;;  %v618_v58 = vmul.f32 %v616_v57, %v594_v54 }
 0x201   : > { %635 = vst.msk [vmem:[#allocation5 + $0x10] sm:$0xff] %vm402_vm4, %v623_v56 }
 0x202   : > { %637 = vst.msk [vmem:[#allocation5 + $0x20] sm:$0xff] %vm402_vm4, %v623_v56  ;;  %v622_v60 = vmul.f32 %v618_v58, %v586_v12 }
 0x203   : > { %639 = vst.msk [vmem:[#allocation5 + $0x30] sm:$0xff] %vm402_vm4, %v623_v56 }
 0x204   : > { %v624_v61 = vsub.f32 %v620_v59, %v622_v60  ;;  %626 = vst.msk [vmem:[#allocation4 + $0x8] sm:$0xff] %vm402_vm4, %v618_v58 }
 0x205   : > { %628 = vst.msk [vmem:[#allocation4 + $0x18] sm:$0xff] %vm402_vm4, %v618_v58 }
 0x206   : > { %630 = vst.msk [vmem:[#allocation4 + $0x28] sm:$0xff] %vm402_vm4, %v618_v58 }
 0x207   : > { %632 = vst.msk [vmem:[#allocation4 + $0x38] sm:$0xff] %vm402_vm4, %v618_v58 }
 0x208   : > { %634 = vst.msk [vmem:[#allocation5 + $0x8] sm:$0xff] %vm402_vm4, %v624_v61 }
 0x209   : > { %636 = vst.msk [vmem:[#allocation5 + $0x18] sm:$0xff] %vm402_vm4, %v624_v61 }
 0x20a   : > { %638 = vst.msk [vmem:[#allocation5 + $0x28] sm:$0xff] %vm402_vm4, %v624_v61 }
 0x20b   : > { %640 = vst.msk [vmem:[#allocation5 + $0x38] sm:$0xff] %vm402_vm4, %v624_v61 }
 0x20c PF: > { %p958_p5 = scmp.ne.s32.totalorder %s1060_s18, 1 }
 0x20e   : > { %644 = sbr.rel (%p958_p5) target bundleno = 708 (0x2c4), region = 56 }
 0x213   : > { %v649_v62 = vld [vmem:[#allocation4 + $0x20] sm:$0xff]  ;;  %v647_v63 = vld [vmem:[#allocation4 + $0x10] sm:$0xff]  ;;  %v1074_v1 = vmov 0   ;;  %v650_v2 = vld [vmem:[#allocation4 + $0x28] sm:$0xff] }
 0x214   : > { %v645_v0 = vld [vmem:[#allocation4] sm:$0xff]  ;;  %1013 = vset.pattern.permute.xlu2 %v1074_v1  ;;  %1012 = vset.pattern.permute.xlu1 %v1074_v1  ;;  %v648_v3 = vld [vmem:[#allocation4 + $0x18] sm:$0xff]  ;;  %v646_v4 = vld [vmem:[#allocation4 + $0x8] sm:$0xff] }
 0x215   : > { %1011 = vset.pattern.permute.xlu0 %v1074_v1  ;;  %675 = vperm.xlu2 %1013, %v649_v62   ;;  %v709_v5 = vld [vmem:[#allocation5] sm:$0xff]  ;;  %v652_v6 = vld [vmem:[#allocation4 + $0x38] sm:$0xff]  ;;  %v651_v7 = vld [vmem:[#allocation4 + $0x30] sm:$0xff] }
 0x216   : > { %665 = vperm.xlu1 %1012, %v647_v63   ;;  %655 = vperm.xlu0 %1011, %v645_v0   ;;  %v712_v8 = vld [vmem:[#allocation5 + $0x18] sm:$0xff]  ;;  %v711_v9 = vld [vmem:[#allocation5 + $0x10] sm:$0xff]  ;;  %v710_v10 = vld [vmem:[#allocation5 + $0x8] sm:$0xff] }
 0x217   : > { %v715_v11 = vld [vmem:[#allocation5 + $0x30] sm:$0xff]  ;;  %v714_v12 = vld [vmem:[#allocation5 + $0x28] sm:$0xff]  ;;  %v713_v13 = vld [vmem:[#allocation5 + $0x20] sm:$0xff] }
 0x218   : > { %v716_v14 = vld [vmem:[#allocation5 + $0x38] sm:$0xff] }
 0x21d   : > { %680 = vperm.xlu2 %1013, %v650_v2  }
 0x21e   : > { %670 = vperm.xlu1 %1012, %v648_v3   ;;  %660 = vperm.xlu0 %1011, %v646_v4  }
 0x225   : > { %719 = vperm.xlu2 %1013, %v709_v5  }
 0x226   : > { %690 = vperm.xlu1 %1012, %v652_v6   ;;  %685 = vperm.xlu0 %1011, %v651_v7  }
 0x22d   : > { %734 = vperm.xlu2 %1013, %v712_v8  }
 0x22e   : > { %729 = vperm.xlu1 %1012, %v711_v9   ;;  %724 = vperm.xlu0 %1011, %v710_v10  }
 0x235   : > { %749 = vperm.xlu2 %1013, %v715_v11  }
 0x236   : > { %744 = vperm.xlu1 %1012, %v714_v12   ;;  %739 = vperm.xlu0 %1011, %v713_v13  }
 0x23e   : > { %754 = vperm.xlu0 %1011, %v716_v14  }
 0x26f   : > { %v1268_v15 = vpop.permute.xlu2 %675 }
 0x277   : > { %v1270_v16 = vpop.permute.xlu2 %680 }
 0x27f   : > { %v720_v17 = vpop.permute.xlu2 %719 }
 0x287   : > { %v735_v26 = vpop.permute.xlu2 %734 }
 0x288   : > { %v666_v18 = vpop.permute.xlu1 %665  ;;  %v656_v19 = vpop.permute.xlu0 %655 }
 0x289   : > { %v693_v20 = vmul.f32 %v656_v19, %v1155_v28  ;;  %v694_v21 = vmul.f32 %v656_v19, %v1157_v29  ;;  %v697_v0 = vmul.f32 %v666_v18, %v1171_v36  ;;  %v698_v3 = vmul.f32 %v666_v18, %v1173_v37 }
 0x28b   : > { %v757_v22 = vadd.f32 %v720_v17, %v693_v20  ;;  %v758_v23 = vadd.f32 %v720_v17, %v694_v21  ;;  %v703_v20 = vmul.f32 %v1270_v16, %v1167_v34  ;;  %v704_v21 = vmul.f32 %v1270_v16, %v1169_v35 }
 0x28d   : > { %v773_v24 = vmul.f32 0.5, %v757_v22  ;;  %v774_v25 = vmul.f32 0.5, %v758_v23  ;;  %v702_v23 = vmul.f32 %v1268_v15, %v1161_v31 }
 0x28f   : > { %1014 = vtanh.f32 %v773_v24 }
 0x290   : > { %1016 = vtanh.f32 %v774_v25  ;;  %v671_v27 = vpop.permute.xlu1 %670  ;;  %v661_v44 = vpop.permute.xlu0 %660 }
 0x291   : > { %v699_v45 = vmul.f32 %v671_v27, %v1179_v40  ;;  %v700_v46 = vmul.f32 %v671_v27, %v1181_v41  ;;  %v750_v40 = vpop.permute.xlu2 %749  ;;  %v695_v4 = vmul.f32 %v661_v44, %v1163_v32  ;;  %v696_v5 = vmul.f32 %v661_v44, %v1165_v33 }
 0x292   : > { %v701_v33 = vmul.f32 %v1268_v15, %v1159_v30 }
 0x293   : > { %v763_v49 = vadd.f32 %v735_v26, %v699_v45  ;;  %v764_v47 = vadd.f32 %v735_v26, %v700_v46 }
 0x295   : > { %v1015_v48 = vpop.eup %1014  ;;  %v779_v50 = vmul.f32 0.5, %v763_v49  ;;  %v780_v28 = vmul.f32 0.5, %v764_v47 }
 0x296   : > { %v1017_v51 = vpop.eup %1016  ;;  %v805_v29 = vadd.f32 1.0, %v1015_v48 }
 0x297   : > { %v806_v52 = vadd.f32 1.0, %v1017_v51  ;;  %1018 = vtanh.f32 %v779_v50 }
 0x298   : > { %v821_v53 = vmul.f32 %v805_v29, %v773_v24  ;;  %1020 = vtanh.f32 %v780_v28  ;;  %v1276_v54 = vpop.permute.xlu1 %690  ;;  %v686_v55 = vpop.permute.xlu0 %685 }
 0x299   : > { %v822_v56 = vmul.f32 %v806_v52, %v774_v25  ;;  %v705_v57 = vmul.f32 %v686_v55, %v1175_v38  ;;  %v706_v41 = vmul.f32 %v686_v55, %v1177_v39  ;;  %v707_v29 = vmul.f32 %v1276_v54, %v1183_v42 }
 0x29a   : > { %v708_v55 = vmul.f32 %v1276_v54, %v1185_v43 }
 0x29b   : > { %v837_v58 = vpack.c.bf16 %v822_v56, %v821_v53  ;;  %v769_v59 = vadd.f32 %v750_v40, %v705_v57  ;;  %v770_v60 = vadd.f32 %v750_v40, %v706_v41 }
 0x29d   : > { %v1019_v61 = vpop.eup %1018  ;;  %845 = vst [vmem:[%s1334_s5] sm:$0xff] %v837_v58  ;;  %v785_v62 = vmul.f32 0.5, %v769_v59  ;;  %v786_v2 = vmul.f32 0.5, %v770_v60 }
 0x29e   : > { %v1021_v63 = vpop.eup %1020  ;;  %v811_v1 = vadd.f32 1.0, %v1019_v61 }
 0x29f   : > { %v812_v38 = vadd.f32 1.0, %v1021_v63  ;;  %1022 = vtanh.f32 %v785_v62 }
 0x2a0   : > { %v827_v39 = vmul.f32 %v811_v1, %v779_v50  ;;  %1024 = vtanh.f32 %v786_v2  ;;  %v730_v6 = vpop.permute.xlu1 %729  ;;  %v725_v7 = vpop.permute.xlu0 %724 }
 0x2a1   : > { %v828_v8 = vmul.f32 %v812_v38, %v780_v28  ;;  %v761_v9 = vadd.f32 %v730_v6, %v697_v0  ;;  %v762_v10 = vadd.f32 %v730_v6, %v698_v3  ;;  %v759_v11 = vadd.f32 %v725_v7, %v695_v4 }
 0x2a2   : > { %v760_v12 = vadd.f32 %v725_v7, %v696_v5 }
 0x2a3   : > { %v840_v36 = vpack.c.bf16 %v828_v8, %v827_v39  ;;  %v777_v13 = vmul.f32 0.5, %v761_v9  ;;  %v778_v14 = vmul.f32 0.5, %v762_v10  ;;  %v775_v17 = vmul.f32 0.5, %v759_v11 }
 0x2a4   : > { %v776_v37 = vmul.f32 0.5, %v760_v12 }
 0x2a5   : > { %v1023_v18 = vpop.eup %1022  ;;  %848 = vst [vmem:[%s1334_s5 + $0x18] sm:$0xff] %v840_v36  ;;  %1026 = vtanh.f32 %v777_v13 }
 0x2a6   : > { %v1025_v32 = vpop.eup %1024  ;;  %v817_v19 = vadd.f32 1.0, %v1023_v18  ;;  %1028 = vtanh.f32 %v778_v14 }
 0x2a7   : > { %v818_v22 = vadd.f32 1.0, %v1025_v32  ;;  %1030 = vtanh.f32 %v775_v17 }
 0x2a8   : > { %v833_v24 = vmul.f32 %v817_v19, %v785_v62  ;;  %1032 = vtanh.f32 %v776_v37  ;;  %v745_v25 = vpop.permute.xlu1 %744  ;;  %v740_v26 = vpop.permute.xlu0 %739 }
 0x2a9   : > { %v834_v27 = vmul.f32 %v818_v22, %v786_v2  ;;  %v767_v44 = vadd.f32 %v745_v25, %v703_v20  ;;  %v768_v30 = vadd.f32 %v745_v25, %v704_v21  ;;  %v765_v45 = vadd.f32 %v740_v26, %v701_v33 }
 0x2aa   : > { %v766_v46 = vadd.f32 %v740_v26, %v702_v23 }
 0x2ab   : > { %v1027_v49 = vpop.eup %1026  ;;  %v843_v47 = vpack.c.bf16 %v834_v27, %v833_v24  ;;  %v783_v34 = vmul.f32 0.5, %v767_v44  ;;  %v784_v48 = vmul.f32 0.5, %v768_v30  ;;  %v781_v50 = vmul.f32 0.5, %v765_v45 }
 0x2ac   : > { %v1029_v35 = vpop.eup %1028  ;;  %v809_v16 = vadd.f32 1.0, %v1027_v49  ;;  %v782_v28 = vmul.f32 0.5, %v766_v46 }
 0x2ad   : > { %v1031_v51 = vpop.eup %1030  ;;  %851 = vst [vmem:[%s1334_s5 + $0x30] sm:$0xff] %v843_v47  ;;  %v810_v31 = vadd.f32 1.0, %v1029_v35  ;;  %1034 = vtanh.f32 %v783_v34 }
 0x2ae   : > { %v1033_v15 = vpop.eup %1032  ;;  %v825_v52 = vmul.f32 %v809_v16, %v777_v13  ;;  %v807_v53 = vadd.f32 1.0, %v1031_v51  ;;  %1036 = vtanh.f32 %v784_v48 }
 0x2af   : > { %v826_v56 = vmul.f32 %v810_v31, %v778_v14  ;;  %v808_v57 = vadd.f32 1.0, %v1033_v15  ;;  %1038 = vtanh.f32 %v781_v50 }
 0x2b0   : > { %v823_v40 = vmul.f32 %v807_v53, %v775_v17  ;;  %1040 = vtanh.f32 %v782_v28  ;;  %v755_v41 = vpop.permute.xlu0 %754 }
 0x2b1   : > { %v839_v58 = vpack.c.bf16 %v826_v56, %v825_v52  ;;  %v824_v59 = vmul.f32 %v808_v57, %v776_v37  ;;  %v771_v60 = vadd.f32 %v755_v41, %v707_v29  ;;  %v772_v61 = vadd.f32 %v755_v41, %v708_v55 }
 0x2b3   : > { %v1035_v62 = vpop.eup %1034  ;;  %847 = vst [vmem:[%s1334_s5 + $0x10] sm:$0xff] %v839_v58  ;;  %v838_v42 = vpack.c.bf16 %v824_v59, %v823_v40  ;;  %v787_v63 = vmul.f32 0.5, %v771_v60  ;;  %v788_v0 = vmul.f32 0.5, %v772_v61 }
 0x2b4   : > { %v1037_v1 = vpop.eup %1036  ;;  %v815_v43 = vadd.f32 1.0, %v1035_v62 }
 0x2b5   : > { %v1039_v54 = vpop.eup %1038  ;;  %846 = vst [vmem:[%s1334_s5 + $0x8] sm:$0xff] %v838_v42  ;;  %v816_v2 = vadd.f32 1.0, %v1037_v1  ;;  %1042 = vtanh.f32 %v787_v63 }
 0x2b6   : > { %v1041_v3 = vpop.eup %1040  ;;  %v831_v38 = vmul.f32 %v815_v43, %v783_v34  ;;  %v813_v4 = vadd.f32 1.0, %v1039_v54  ;;  %1044 = vtanh.f32 %v788_v0 }
 0x2b7   : > { %v832_v39 = vmul.f32 %v816_v2, %v784_v48  ;;  %v814_v5 = vadd.f32 1.0, %v1041_v3 }
 0x2b8   : > { %v829_v6 = vmul.f32 %v813_v4, %v781_v50 }
 0x2b9   : > { %v842_v7 = vpack.c.bf16 %v832_v39, %v831_v38  ;;  %v830_v8 = vmul.f32 %v814_v5, %v782_v28 }
 0x2bb   : > { %v1043_v9 = vpop.eup %1042  ;;  %850 = vst [vmem:[%s1334_s5 + $0x28] sm:$0xff] %v842_v7  ;;  %v841_v10 = vpack.c.bf16 %v830_v8, %v829_v6 }
 0x2bc   : > { %v1045_v11 = vpop.eup %1044  ;;  %v819_v12 = vadd.f32 1.0, %v1043_v9 }
 0x2bd   : > { %849 = vst [vmem:[%s1334_s5 + $0x20] sm:$0xff] %v841_v10  ;;  %v820_v36 = vadd.f32 1.0, %v1045_v11 }
 0x2be   : > { %v835_v13 = vmul.f32 %v819_v12, %v787_v63 }
 0x2bf   : > { %v836_v14 = vmul.f32 %v820_v36, %v788_v0 }
 0x2c1   : > { %v844_v17 = vpack.c.bf16 %v836_v14, %v835_v13 }
 0x2c3   : > { %852 = vst [vmem:[%s1334_s5 + $0x38] sm:$0xff] %v844_v17 }
 0x2c4 PF: > { %s15_s20 = sadd.s32 1, %s1068_s20   ;;  %s1335_s18 = smov %s1064_s19 }
 0x2c5   : > { %p12_p6 = scmp.ge.s32.totalorder %s15_s20, 4   ;;  %s1336_s19 = smov %s1338_s21 }
 0x2c7   :  { %14 = sbr.rel (!%p12_p6) target bundleno = 2 (0x2), region = 87 }

// kernel: cnn_variational_decoder_fwd.7
= control target key start
LH: loop header
LB: loop body
LE: loop exit
PB: predicated region body
PF: predicated region fallthrough
CT: control target
= control target key end

     0   :  { %s626_s12 = smov 0   ;;  %s778_s0 = inlined_call_operand.vmem [shape: bf16[16,1152], index: 0, kind: input, shape index: {}]   ;;  %s779_s1 = inlined_call_operand.vmem [shape: bf16[4,144], index: 1, kind: input, shape index: {}]   ;;  %s780_s2 = inlined_call_operand.vmem [shape: f32[4,1], index: 2, kind: input, shape index: {}]   ;;  %s781_s3 = inlined_call_operand.vmem [shape: f32[4,1024], index: 3, kind: output, shape index: {}]  }
   0x1 LB: > { %s523_s13 = sadd.s32 4294967295, %s595_s12   ;;  %p526_p0 = scmp.ge.s32.totalorder %s595_s12, 1  ;;  %s595_s12 = sphi %s626_s12, %s13_s12  }
   0x2   : > { %p127_p1 = scmp.lt.s32.totalorder %s595_s12, 3 }
   0x4   : > { %p128_p2 = pnand %p526_p0, %p127_p1 }
   0x5   : > { %s529_s14 = sshll.u32 (!%p128_p2), %s523_s13, 9  ;;  %s597_s20 = smov (!%p128_p2), 91  }
   0x6   : > { %131 = sbr.rel (%p128_p2) target bundleno = 401 (0x191), region = 32  ;;  %s154_s15 = sshra.s32 (!%p128_p2), %s529_s14, 7 }
   0x7   : > { %s530_s16 = sshll.u32 (!%p128_p2), %s154_s15, 2  ;;  %s598_s21 = smov (!%p128_p2), 92  }
   0x8   : > { %s157_s19 = scalar_lea.vmem (!%p128_p2), %s778_s0, %s530_s16  ;;  %s599_s22 = smov (!%p128_p2), 108  }
   0x9   : > { %s600_s23 = smov (!%p128_p2), 109   ;;  %s601_s24 = smov (!%p128_p2), 110  }
   0xa   : > { %s602_s25 = smov (!%p128_p2), 126   ;;  %s603_s26 = smov (!%p128_p2), 127  }
   0xb   : > { %v533_v0 = vld [vmem:[%s157_s19] sm:$0xf]  ;;  %v559_v1 = vld [vmem:[%s157_s19 + $0x20] sm:$0xf0]  ;;  %v535_v4 = vld [vmem:[%s157_s19 + $0x24] sm:$0xf0] }
   0xc   : > { %v557_v2 = vld [vmem:[%s157_s19 + $0x4] sm:$0xf]  ;;  %v639_v3 = vor.u32 %v559_v1, %v533_v0  ;;  %v541_v6 = vld [vmem:[%s157_s19 + $0x8] sm:$0xf]  ;;  %v560_v7 = vld [vmem:[%s157_s19 + $0x28] sm:$0xf0] }
   0xd   : > { %v641_v5 = vor.u32 %v557_v2, %v535_v4  ;;  %v646_v8 = vor.u32 %v560_v7, %v541_v6  ;;  %v558_v9 = vld [vmem:[%s157_s19 + $0xc] sm:$0xf]  ;;  %v543_v10 = vld [vmem:[%s157_s19 + $0x2c] sm:$0xf0]  ;;  %v561_v13 = vld [vmem:[%s157_s19 + $0x30] sm:$0xf0] }
   0xe   : > { %303 = vrot.lane.b32.xlu2 %v639_v3, %s597_s20  ;;  %v657_v11 = vor.u32 %v558_v9, %v543_v10  ;;  %v549_v12 = vld [vmem:[%s157_s19 + $0x10] sm:$0xf]  ;;  %s604_s27 = smov 90   ;;  %vm313_vm0 = vcmask 744448   ;;  %vm294_vm1 = vcmask 752640   ;;  %vm275_vm2 = vcmask 883712  }
   0xf   : > { %286 = vrot.lane.b32.xlu1 %v641_v5, %s598_s21  ;;  %305 = vrot.lane.b32.xlu0 %v641_v5, %s597_s20  ;;  %v550_v14 = vor.u32 %v561_v13, %v549_v12  ;;  %vm256_vm3 = vcmask 891904   ;;  %vm237_vm4 = vcmask 900096   ;;  %vm218_vm5 = vcmask 1031168   ;;  %v341_v52 = vld [vmem:[%s779_s1] sm:$0xf]  ;;  %s527_s5 = sshll.u32 %s523_s13, 2 }
  0x10   : > { %349 = vst [vmem:[#allocation1] ss:$4 sm:$0xff] %v341_v52  ;;  %vm199_vm6 = vcmask 1039360   ;;  %vm332_vm7 = vcmask 736256   ;;  %vm353_vm8 = vcmask 130048   ;;  %p147_p3 = scmp.lt.s32.totalorder %s527_s5, 7 }
  0x11   : > { %vm470_vm9 = vcmask 1043456  }
  0x12   : > { %s783_s5 = smov (!%p147_p3, %s527_s5), 7 }
  0x13   : > { %s528_s6 = sshll.u32 %s783_s5, 2 }
  0x14   : > { %s150_s9 = scalar_lea.vmem %s781_s3, %s528_s6 }
  0x16   : > { %267 = vrot.lane.b32.xlu2 %v641_v5, %s599_s22 }
  0x17   : > { %288 = vrot.lane.b32.xlu1 %v646_v8, %s598_s21  ;;  %307 = vrot.lane.b32.xlu0 %v646_v8, %s597_s20  ;;  %v729_v61 = vld.sshfl [vmem:[#allocation1] sm:$0xff pattern:$0x73625140]  ;;  %v351_v4 = vld.sshfl [vmem:[#allocation1 + $0x8] sm:$0xff pattern:$0x73625140] }
  0x1e   : > { %248 = vrot.lane.b32.xlu2 %v641_v5, %s600_s23 }
  0x1f   : > { %284 = vrot.lane.b32.xlu1 %v639_v3, %s598_s21  ;;  %269 = vrot.lane.b32.xlu0 %v646_v8, %s599_s22 }
  0x26   : > { %309 = vrot.lane.b32.xlu2 %v657_v11, %s597_s20 }
  0x27   : > { %265 = vrot.lane.b32.xlu1 %v639_v3, %s599_s22  ;;  %250 = vrot.lane.b32.xlu0 %v646_v8, %s600_s23 }
  0x2e   : > { %231 = vrot.lane.b32.xlu2 %v646_v8, %s601_s24 }
  0x2f   : > { %229 = vrot.lane.b32.xlu1 %v641_v5, %s601_s24  ;;  %311 = vrot.lane.b32.xlu0 %v550_v14, %s597_s20 }
  0x36   : > { %292 = vrot.lane.b32.xlu2 %v550_v14, %s598_s21 }
  0x37   : > { %290 = vrot.lane.b32.xlu1 %v657_v11, %s598_s21  ;;  %246 = vrot.lane.b32.xlu0 %v639_v3, %s600_s23 }
  0x3e   : > { %227 = vrot.lane.b32.xlu2 %v639_v3, %s601_s24 }
  0x3f   : > { %212 = vrot.lane.b32.xlu1 %v646_v8, %s602_s25  ;;  %210 = vrot.lane.b32.xlu0 %v641_v5, %s602_s25 }
  0x46   : > { %191 = vrot.lane.b32.xlu2 %v641_v5, %s603_s26 }
  0x47   : > { %273 = vrot.lane.b32.xlu1 %v550_v14, %s599_s22  ;;  %271 = vrot.lane.b32.xlu0 %v657_v11, %s599_s22 }
  0x4e   : > { %252 = vrot.lane.b32.xlu2 %v657_v11, %s600_s23 }
  0x4f   : > { %208 = vrot.lane.b32.xlu1 %v639_v3, %s602_s25  ;;  %193 = vrot.lane.b32.xlu0 %v646_v8, %s603_s26 }
  0x56   : > { %328 = vrot.lane.b32.xlu2 %v657_v11, %s604_s27 }
  0x57   : > { %326 = vrot.lane.b32.xlu1 %v646_v8, %s604_s27  ;;  %254 = vrot.lane.b32.xlu0 %v550_v14, %s600_s23 }
  0x5e   : > { %235 = vrot.lane.b32.xlu2 %v550_v14, %s601_s24 }
  0x5f   : > { %233 = vrot.lane.b32.xlu1 %v657_v11, %s601_s24  ;;  %189 = vrot.lane.b32.xlu0 %v639_v3, %s603_s26 }
  0x66   : > { %322 = vrot.lane.b32.xlu2 %v639_v3, %s604_s27 }
  0x67   : > { %216 = vrot.lane.b32.xlu1 %v550_v14, %s602_s25  ;;  %214 = vrot.lane.b32.xlu0 %v657_v11, %s602_s25 }
  0x68   : > { %v304_v15 = vpop.permute.xlu2 %303 }
  0x6e   : > { %197 = vrot.lane.b32.xlu2 %v550_v14, %s603_s26 }
  0x6f   : > { %195 = vrot.lane.b32.xlu1 %v657_v11, %s603_s26  ;;  %324 = vrot.lane.b32.xlu0 %v641_v5, %s604_s27 }
  0x70   : > { %v268_v16 = vpop.permute.xlu2 %267 }
  0x77   : > { %330 = vrot.lane.b32.xlu0 %v550_v14, %s604_s27  ;;  %v342_v14 = vld [vmem:[%s780_s2] sm:$0xf] }
  0x78   : > { %v249_v17 = vpop.permute.xlu2 %248 }
  0x80   : > { %v689_v18 = vpop.permute.xlu2 %309 }
  0x81   : > { %v287_v19 = vpop.permute.xlu1 %286  ;;  %v306_v20 = vpop.permute.xlu0 %305 }
  0x82   : > { %v314_v21 = vsel %vm313_vm0, %v304_v15, %v306_v20 }
  0x83   : > { %356 = vmatpush.bf16.msra.mxu0 %v314_v21 }
  0x88   : > { %v692_v22 = vpop.permute.xlu2 %231 }
  0x89   : > { %v289_v23 = vpop.permute.xlu1 %288  ;;  %v308_v24 = vpop.permute.xlu0 %307 }
  0x8a   : > { %v315_v25 = vsel %vm313_vm0, %v306_v20, %v308_v24  ;;  %v697_v26 = vsel %vm313_vm0, %v308_v24, %v689_v18  ;;  %v296_v27 = vsel %vm294_vm1, %v287_v19, %v289_v23 }
  0x8b   : > { %382 = vmatpush.bf16.msra.mxu2 %v315_v25 }
  0x8f   : > { %383 = vmatpush.bf16.msra.mxu2 %v296_v27 }
  0x90   : > { %v700_v28 = vpop.permute.xlu2 %292 }
  0x91   : > { %v285_v29 = vpop.permute.xlu1 %284  ;;  %v270_v30 = vpop.permute.xlu0 %269 }
  0x92   : > { %v295_v31 = vsel %vm294_vm1, %v285_v29, %v287_v19  ;;  %v277_v32 = vsel %vm275_vm2, %v268_v16, %v270_v30 }
  0x93   : > { %357 = vmatpush.bf16.msra.mxu0 %v295_v31  ;;  %384 = vmatpush.bf16.msra.mxu2 %v277_v32 }
  0x98   : > { %v228_v33 = vpop.permute.xlu2 %227 }
  0x99   : > { %v266_v34 = vpop.permute.xlu1 %265  ;;  %v251_v35 = vpop.permute.xlu0 %250 }
  0x9a   : > { %v276_v36 = vsel %vm275_vm2, %v266_v34, %v268_v16  ;;  %v258_v37 = vsel %vm256_vm3, %v249_v17, %v251_v35 }
  0x9b   : > { %358 = vmatpush.bf16.msra.mxu0 %v276_v36  ;;  %385 = vmatpush.bf16.msra.mxu2 %v258_v37 }
  0xa0   : > { %v192_v38 = vpop.permute.xlu2 %191 }
  0xa1   : > { %v230_v39 = vpop.permute.xlu1 %229  ;;  %v312_v40 = vpop.permute.xlu0 %311 }
  0xa2   : > { %v239_v41 = vsel %vm237_vm4, %v230_v39, %v692_v22  ;;  %v238_v48 = vsel %vm237_vm4, %v228_v33, %v230_v39  ;;  %v317_v1 = vsel %vm313_vm0, %v689_v18, %v312_v40  ;;  %v605_v18 = vmov 0  }
  0xa3   : > { %386 = vmatpush.bf16.msra.mxu2 %v239_v41  ;;  %579 = vset.pattern.permute.xlu1 %v605_v18 }
  0xa4   : > { %580 = vset.pattern.permute.xlu0 %v605_v18  ;;  %345 = vperm.xlu1 %579, %v342_v14  }
  0xa8   : > { %v253_v42 = vpop.permute.xlu2 %252 }
  0xa9   : > { %v291_v43 = vpop.permute.xlu1 %290  ;;  %v247_v44 = vpop.permute.xlu0 %246  ;;  %v709_v45 = vsel %vm256_vm3, %v251_v35, %v253_v42 }
  0xaa   : > { %v257_v46 = vsel %vm256_vm3, %v247_v44, %v249_v17  ;;  %v713_v47 = vsel %vm294_vm1, %v289_v23, %v291_v43 }
  0xab   : > { %359 = vmatpush.bf16.msra.mxu0 %v257_v46 }
  0xaf   : > { %360 = vmatpush.bf16.msra.mxu0 %v238_v48 }
  0xb0   : > { %v329_v60 = vpop.permute.xlu2 %328 }
  0xb1   : > { %v213_v49 = vpop.permute.xlu1 %212  ;;  %v211_v50 = vpop.permute.xlu0 %210 }
  0xb2   : > { %v220_v51 = vsel %vm218_vm5, %v211_v50, %v213_v49 }
  0xb3   : > { %387 = vmatpush.bf16.msra.mxu2 %v220_v51 }
  0xb8   : > { %v236_v2 = vpop.permute.xlu2 %235 }
  0xb9   : > { %v274_v53 = vpop.permute.xlu1 %273  ;;  %v272_v54 = vpop.permute.xlu0 %271 }
  0xba   : > { %v721_v55 = vsel %vm275_vm2, %v270_v30, %v272_v54  ;;  %v279_v10 = vsel %vm275_vm2, %v272_v54, %v274_v53 }
  0xc0   : > { %v323_v12 = vpop.permute.xlu2 %322 }
  0xc1   : > { %v209_v56 = vpop.permute.xlu1 %208  ;;  %v723_v57 = vpop.permute.xlu0 %193 }
  0xc2   : > { %v219_v58 = vsel %vm218_vm5, %v209_v56, %v211_v50  ;;  %v201_v59 = vsel %vm199_vm6, %v192_v38, %v723_v57 }
  0xc3   : > { %361 = vmatpush.bf16.msra.mxu0 %v219_v58  ;;  %388 = vmatpush.bf16.msra.mxu2 %v201_v59 }
  0xc7   : > { %389 = vmatpush.bf16.msra.mxu2 %v641_v5  ;;  %v298_v5 = vsel %vm294_vm1, %v291_v43, %v700_v28 }
  0xc8   : > { %v198_v20 = vpop.permute.xlu2 %197 }
  0xc9   : > { %v327_v62 = vpop.permute.xlu1 %326  ;;  %v255_v63 = vpop.permute.xlu0 %254 }
  0xca   : > { %v335_v0 = vsel %vm332_vm7, %v327_v62, %v329_v60  ;;  %390 = vmatmul.bf16.vlgmr.msra.gmra.mxu2 %v729_v61  ;;  %v260_v13 = vsel %vm256_vm3, %v253_v42, %v255_v63 }
  0xcb   : > { %428 = vmatpush.bf16.msra.mxu3 %v335_v0 }
  0xce   : > { %553 = vmatmul.msk.bf16.vlgmr.msra.gmra.mxu3 %vm353_vm8, %v351_v4 }
  0xcf   : > { %434 = vmatpush.bf16.msrb.mxu3 %v317_v1 }
  0xd1   : > { %v234_v6 = vpop.permute.xlu1 %233  ;;  %v190_v7 = vpop.permute.xlu0 %189 }
  0xd2   : > { %v200_v9 = vsel %vm199_vm6, %v190_v7, %v192_v38  ;;  %v241_v17 = vsel %vm237_vm4, %v234_v6, %v236_v2 }
  0xd3   : > { %435 = vmatpush.bf16.msrb.mxu3 %v298_v5  ;;  %362 = vmatpush.bf16.msra.mxu0 %v200_v9 }
  0xd7   : > { %436 = vmatpush.bf16.msrb.mxu3 %v279_v10  ;;  %363 = vmatpush.bf16.msra.mxu0 %v639_v3 }
  0xd9   : > { %v217_v15 = vpop.permute.xlu1 %216  ;;  %v215_v16 = vpop.permute.xlu0 %214 }
  0xda   : > { %364 = vmatmul.bf16.vlgmr.msra.gmra.mxu0 %v729_v61  ;;  %v221_v19 = vsel %vm218_vm5, %v213_v49, %v215_v16  ;;  %v222_v3 = vsel %vm218_vm5, %v215_v16, %v217_v15 }
  0xdb   : > { %437 = vmatpush.bf16.msrb.mxu3 %v260_v13 }
  0xdf   : > { %438 = vmatpush.bf16.msrb.mxu3 %v241_v17 }
  0xe1   : > { %v196_v21 = vpop.permute.xlu1 %195  ;;  %v325_v23 = vpop.permute.xlu0 %324 }
  0xe2   : > { %v333_v24 = vsel %vm332_vm7, %v323_v12, %v325_v23  ;;  %v334_v25 = vsel %vm332_vm7, %v325_v23, %v327_v62  ;;  %v203_v27 = vsel %vm199_vm6, %v196_v21, %v198_v20 }
  0xe3   : > { %439 = vmatpush.bf16.msrb.mxu3 %v222_v3  ;;  %376 = vmatpush.bf16.msra.mxu1 %v333_v24 }
  0xe4   : > { %402 = vmatpush.bf16.msrb.mxu2 %v334_v25 }
  0xe6   : > { %551 = vmatmul.msk.bf16.vlgmr.msra.gmra.mxu1 %vm353_vm8, %v351_v4 }
  0xe7   : > { %408 = vmatpush.bf16.msrb.mxu1 %v697_v26  ;;  %440 = vmatpush.bf16.msrb.mxu3 %v203_v27  ;;  %v240_v26 = vsel %vm237_vm4, %v692_v22, %v234_v6 }
  0xe8   : > { %552 = vmatmul.msk.bf16.vlgmr.msrb.gmra.mxu2 %vm353_vm8, %v351_v4 }
  0xe9   : > { %v331_v28 = vpop.permute.xlu0 %330 }
  0xea   : > { %v336_v29 = vsel %vm332_vm7, %v329_v60, %v331_v28 }
  0xeb   : > { %409 = vmatpush.bf16.msrb.mxu1 %v713_v47  ;;  %441 = vmatpush.bf16.msrb.mxu3 %v657_v11  ;;  %v202_v11 = vsel %vm199_vm6, %v723_v57, %v196_v21 }
  0xec   : > { %454 = vmatpush.bf16.msrb.mxu0 %v336_v29 }
  0xee   : > { %442 = vmatmul.bf16.vlgmr.msrb.gmra.mxu3 %v729_v61 }
  0xef   : > { %410 = vmatpush.bf16.msrb.mxu1 %v721_v55  ;;  %554 = vmatmul.msk.bf16.vlgmr.msrb.gmra.mxu0 %vm353_vm8, %v351_v4 }
  0xf3   : > { %411 = vmatpush.bf16.msrb.mxu1 %v709_v45 }
  0xf7   : > { %412 = vmatpush.bf16.msrb.mxu1 %v240_v26 }
  0xfb   : > { %413 = vmatpush.bf16.msrb.mxu1 %v221_v19 }
  0xff   : > { %414 = vmatpush.bf16.msrb.mxu1 %v202_v11 }
 0x103   : > { %415 = vmatpush.bf16.msrb.mxu1 %v646_v8 }
 0x106   : > { %416 = vmatmul.bf16.vlgmr.msrb.gmra.mxu1 %v729_v61 }
 0x116   : > { %v346_v36 = vpop.permute.xlu1 %345 }
 0x14d   : > { %v391_v30 = vpop.f32.mrf.mxu2 }
 0x14e   : > { %v392_v38 = vadd.f32 %v391_v30, %v346_v36 }
 0x151   : > { %v430_v31 = vpop.f32.mrf.mxu3 }
 0x155   : > { %v393_v32 = vpop.f32.mrf.mxu2 }
 0x157   : > { %v365_v33 = vpop.f32.mrf.mxu0 }
 0x158   : > { %v366_v22 = vadd.f32 %v365_v33, %v346_v36 }
 0x159   : > { %v432_v34 = vpop.f32.mrf.mxu3 }
 0x15f   : > { %v367_v35 = vpop.f32.mrf.mxu0 }
 0x163   : > { %v378_v37 = vpop.f32.mrf.mxu1 }
 0x164   : > { %v379_v39 = vadd.f32 %v378_v37, %v366_v22 }
 0x166   : > { %581 = vtanh.f32 %v379_v39 }
 0x16b   : > { %v404_v40 = vpop.f32.mrf.mxu2  ;;  %v380_v8 = vpop.f32.mrf.mxu1 }
 0x16c   : > { %v405_v41 = vadd.f32 %v404_v40, %v392_v38  ;;  %v456_v42 = vpop.f32.mrf.mxu0  ;;  %v582_v44 = vpop.eup %581 }
 0x16e   : > { %583 = vtanh.f32 %v405_v41 }
 0x171   : > { %v443_v43 = vpop.f32.mrf.mxu3 }
 0x172   : > { %v444_v51 = vadd.f32 %v443_v43, %v346_v36 }
 0x173   : > { %v406_v45 = vpop.f32.mrf.mxu2 }
 0x174   : > { %v584_v46 = vpop.eup %583  ;;  %v458_v48 = vpop.f32.mrf.mxu0  ;;  %v457_v52 = vadd.f32 %v456_v42, %v444_v51 }
 0x175   : > { %v468_v47 = vrot.slane %v584_v46, 4 }
 0x176   : > { %585 = vtanh.f32 %v457_v52 }
 0x177   : > { %v471_v49 = vsel %vm470_vm9, %v582_v44, %v468_v47 }
 0x178   : > { %475 = vst [vmem:[%s150_s9] sm:$0xff] %v471_v49 }
 0x179   : > { %v445_v50 = vpop.f32.mrf.mxu3 }
 0x17c   : > { %v586_v56 = vpop.eup %585 }
 0x17d   : > { %v469_v57 = vrot.slane %v586_v56, 4 }
 0x183   : > { %v417_v53 = vpop.f32.mrf.mxu1 }
 0x184   : > { %v418_v54 = vadd.f32 %v417_v53, %v346_v36 }
 0x186   : > { %v431_v55 = vadd.f32 %v430_v31, %v418_v54 }
 0x188   : > { %587 = vtanh.f32 %v431_v55 }
 0x18b   : > { %v419_v58 = vpop.f32.mrf.mxu1 }
 0x18e   : > { %v588_v59 = vpop.eup %587 }
 0x18f   : > { %v472_v60 = vsel %vm470_vm9, %v588_v59, %v469_v57 }
 0x190   : > { %476 = vst [vmem:[%s150_s9 + $0x8] sm:$0xff] %v472_v60 }
 0x191 PF: > { %s13_s12 = sadd.s32 1, %s595_s12  }
 0x192   : > { %p10_p4 = scmp.ge.s32.totalorder %s13_s12, 4  }
 0x194   :  { %12 = sbr.rel (!%p10_p4) target bundleno = 1 (0x1), region = 60 }

</bundles_post_ra>
